<compile_context>
chip_gen: v6e
topology: v6e:2x2x1
jax: 0.10.0
libtpu: 0.0.40
codegen_flags: <defaults>
</compile_context>

<pallas_src>
import jax
import jax.numpy as jnp
import numpy as np
from jax.experimental import pallas as pl
from jax.experimental.pallas import tpu as pltpu


# ----------------------------- Pallas kernel ---------------------------------
def distance_lstm_kernel(x_ref,                      # (T, Bp, I)   f32
                         wih0_ref, b0_ref,           # (I, 8H), (1, 8H)  f32  (layer-1 cols zero)
                         w_ref,                      # (2H, 8H)     bf16 stacked recurrent weights
                         b1_ref,                     # (1, 8H)      f32  (layer-0 cols zero)
                         wfc_ref, bfc_ref,           # (O, H), (1, O)   f32
                         out_ref):                   # (Bp, O)      f32
    T, B, I = x_ref.shape
    G8 = w_ref.shape[1]            # 8H
    H = G8 // 8
    H2, H4, H6 = 2 * H, 4 * H, 6 * H

    w = w_ref[...]                 # (2H, 8H) bf16 — hoisted
    b1 = b1_ref[...]               # (1, 8H)  f32

    # ---- layer-0 input projection for all timesteps: no recurrence dependency,
    #      hoisted off the serial chain (pure VPU outer product when I == 1).
    if I == 1:
        xg = x_ref[...] * wih0_ref[...] + b0_ref[...]            # (T, B, 8H)
    else:
        xg = (jnp.dot(x_ref[...].reshape(T * B, I), wih0_ref[...],
                      preferred_element_type=jnp.float32)
              .reshape(T, B, G8) + b0_ref[...])
    # Pre-fold the layer-1 bias so each fused stage needs a single VPU add.
    xgb = xg + b1                                                 # (T, B, 8H)

    def act(gates, c01):
        # Column layout: [i0,i1 | f0,f1 | o0,o1 | g0,g1]; every 2H slice below
        # starts at a multiple of 128 lanes -> no lane shuffles.
        sig = jax.nn.sigmoid(gates[:, :H6])        # one fused sigmoid (6H lanes)
        i01 = sig[:, 0:H2]
        f01 = sig[:, H2:H4]
        o01 = sig[:, H4:H6]
        g01 = jnp.tanh(gates[:, H6:])              # one tanh (2H lanes)
        c_new = f01 * c01 + i01 * g01              # packed [c0 | c1] update
        h_new = o01 * jnp.tanh(c_new)              # packed [h0 | h1] update
        return h_new, c_new

    # ---- prologue (layer 0 at t=0): initial h,c are zero and the layer-1
    #      columns of xg are zero (g1 pre-activation = 0 => c1 = h1 = 0 exactly),
    #      so the packed activation yields [h0(0) | 0], [c0(0) | 0].
    h01, c01 = act(xg[0], jnp.zeros((B, H2), jnp.float32))

    # ---- skewed stages s = 0..T-1 (fully unrolled):
    #      one (B,2H)x(2H,8H) bf16 matmul -> layer-0 gates of step s+1 (rec. part)
    #      and layer-1 gates of step s, then one fused packed activation.
    for s in range(T):
        raw = jnp.dot(h01.astype(jnp.bfloat16), w,
                      preferred_element_type=jnp.float32)         # (B, 8H) f32
        gates = raw + (xgb[s + 1] if s < T - 1 else b1)
        h01, c01 = act(gates, c01)
        # h01 is now [h0(s+1) | h1(s)] — already the next stage's matmul LHS.

    h1_last = h01[:, H:H2]        # layer-1 hidden state at the final timestep

    # ---- final Linear.  O == 1 is a degenerate MXU shape: use VPU mul + lane
    #      reduce instead (kept in f32).
    O = wfc_ref.shape[0]
    if O == 1:
        out_ref[...] = (jnp.sum(h1_last * wfc_ref[...], axis=-1, keepdims=True)
                        + bfc_ref[...])
    else:
        out_ref[...] = (jax.lax.dot_general(h1_last, wfc_ref[...],
                                            (((1,), (1,)), ((), ())),
                                            preferred_element_type=jnp.float32)
                        + bfc_ref[...])


# ------------------------------ wrapper ---------------------------------------
def distance_lstm_forward(x_btl, kp):
    """x_btl: (B, T, I) float32 (PyTorch batch_first convention)."""
    B, T, I = x_btl.shape
    O = kp["wfc"].shape[0]

    # Pad batch to a multiple of 16 (bf16 sublane packing of the (Bp,2H) matmul
    # LHS); padded rows are independent and sliced off afterwards.
    Bp = ((B + 15) // 16) * 16
    x_tbl = jnp.transpose(x_btl, (1, 0, 2))                 # time-major (T, B, I)
    if Bp != B:
        x_tbl = jnp.pad(x_tbl, ((0, 0), (0, Bp - B), (0, 0)))

    vmem = pl.BlockSpec(memory_space=pltpu.MemorySpace.VMEM)
    out = pl.pallas_call(
        distance_lstm_kernel,
        out_shape=jax.ShapeDtypeStruct((Bp, O), jnp.float32),
        in_specs=[vmem] * 7,
        out_specs=vmem,
    )(x_tbl, kp["wih0_8"], kp["b0_8"], kp["w"], kp["b1_8"], kp["wfc"], kp["bfc"])
    return out[:B]


# ------------------------- deterministic param init ---------------------------
def init_torch_params(key, input_size=1, hidden_size=64, output_size=1):
    """Parameters in the native PyTorch layout (nn.LSTM / nn.Linear)."""
    H = hidden_size
    k = 1.0 / np.sqrt(H)
    keys = jax.random.split(key, 10)

    def u(k_, shape):
        return jax.random.uniform(k_, shape, jnp.float32, minval=-k, maxval=k)

    return {
        "W_ih_l0": u(keys[0], (4 * H, input_size)),
        "W_hh_l0": u(keys[1], (4 * H, H)),
        "b_ih_l0": u(keys[2], (4 * H,)),
        "b_hh_l0": u(keys[3], (4 * H,)),
        "W_ih_l1": u(keys[4], (4 * H, H)),
        "W_hh_l1": u(keys[5], (4 * H, H)),
        "b_ih_l1": u(keys[6], (4 * H,)),
        "b_hh_l1": u(keys[7], (4 * H,)),
        "W_fc":    u(keys[8], (output_size, H)),
        "b_fc":    u(keys[9], (output_size,)),
    }


def prepare_kernel_params(tp, hidden_size):
    """One-time prep (outside the kernel):
       * transpose weights, permute gate blocks from PyTorch's [i,f,g,o] to [i,f,o,g],
       * build the block-stacked recurrent RHS (2H, 8H) with column layout
         [i0,i1,f0,f1,o0,o1,g0,g1] (bf16),
       * embed the layer-0 input weights/biases and layer-1 biases into the same
         8H column layout (their "other layer" columns are zero),
       * fold the two per-layer LSTM bias vectors."""
    H = hidden_size
    G = 4 * H
    perm = np.concatenate([np.arange(0, H),             # i
                           np.arange(H, 2 * H),         # f
                           np.arange(3 * H, 4 * H),     # o
                           np.arange(2 * H, 3 * H)])    # g

    def wt(wmat):          # (4H, in) -> (in, 4H) with gate-permuted columns
        return jnp.transpose(jnp.asarray(wmat, jnp.float32))[:, perm]

    def interleave(l0, l1):
        # l0, l1: (R, 4H) destined for the layer-0 / layer-1 column slots.
        # Result: (R, 8H) with columns [i0,i1,f0,f1,o0,o1,g0,g1].
        R = l0.shape[0]
        return jnp.stack([l0.reshape(R, 4, H), l1.reshape(R, 4, H)],
                         axis=2).reshape(R, 8 * H)

    I = tp["W_ih_l0"].shape[1]
    zeros_h = jnp.zeros((H, G), jnp.float32)
    zeros_i = jnp.zeros((I, G), jnp.float32)
    zeros_b = jnp.zeros((1, G), jnp.float32)

    w_hh0 = wt(tp["W_hh_l0"])
    w_ih1 = wt(tp["W_ih_l1"])
    w_hh1 = wt(tp["W_hh_l1"])

    # Stacked recurrent RHS: rows 0:H multiply h0(t), rows H:2H multiply h1(t-1).
    top = interleave(w_hh0, w_ih1)        # (H, 8H)
    bot = interleave(zeros_h, w_hh1)      # (H, 8H)
    w_stacked = jnp.concatenate([top, bot], axis=0).astype(jnp.bfloat16)

    b0 = (tp["b_ih_l0"] + tp["b_hh_l0"])[perm][None, :]
    b1 = (tp["b_ih_l1"] + tp["b_hh_l1"])[perm][None, :]

    return {
        "wih0_8": interleave(wt(tp["W_ih_l0"]), zeros_i),   # (I, 8H) f32
        "b0_8":   interleave(b0, zeros_b),                  # (1, 8H) f32
        "w":      w_stacked,                                # (2H, 8H) bf16
        "b1_8":   interleave(zeros_b, b1),                  # (1, 8H) f32
        "wfc":    jnp.asarray(tp["W_fc"], jnp.float32),     # (O, H)  f32
        "bfc":    jnp.asarray(tp["b_fc"], jnp.float32)[None, :],  # (1, O)
    }


# --------------------------- pure-JAX reference --------------------------------
def distance_lstm_ref(x_btl, tp):
    """Pure-JAX reference following nn.LSTM / nn.Linear semantics exactly (f32)."""
    B, T, I = x_btl.shape
    H = tp["W_hh_l0"].shape[1]

    def cell(x_t, h, c, Wih, Whh, bih, bhh):
        gates = x_t @ Wih.T + bih + h @ Whh.T + bhh
        i = jax.nn.sigmoid(gates[:, 0:H])
        f = jax.nn.sigmoid(gates[:, H:2 * H])
        g = jnp.tanh(gates[:, 2 * H:3 * H])
        o = jax.nn.sigmoid(gates[:, 3 * H:4 * H])
        c = f * c + i * g
        h = o * jnp.tanh(c)
        return h, c

    h0 = c0 = h1 = c1 = jnp.zeros((B, H), jnp.float32)
    for t in range(T):
        x_t = x_btl[:, t, :]
        h0, c0 = cell(x_t, h0, c0, tp["W_ih_l0"], tp["W_hh_l0"],
                      tp["b_ih_l0"], tp["b_hh_l0"])
        h1, c1 = cell(h0, h1, c1, tp["W_ih_l1"], tp["W_hh_l1"],
                      tp["b_ih_l1"], tp["b_hh_l1"])
    return h1 @ tp["W_fc"].T + tp["b_fc"]


if __name__ == "__main__":
    key = jax.random.PRNGKey(0)
    k_x, k_p = jax.random.split(key)

    B, T, I, H, O = 4, 8, 1, 64, 1
    x = jax.random.normal(k_x, (B, T, I), jnp.float32)

    torch_params = init_torch_params(k_p, input_size=I, hidden_size=H,
                                     output_size=O)
    kernel_params = prepare_kernel_params(torch_params, hidden_size=H)

    out = distance_lstm_forward(x, kernel_params)
    out = jax.block_until_ready(out)

    ref = distance_lstm_ref(x, torch_params)
    # bf16 matmul operands (f32 accumulation) => relaxed tolerance vs. f32 ref.
    np.testing.assert_allclose(np.asarray(out), np.asarray(ref),
                               rtol=2e-2, atol=2e-2)

    print("KERNEL_OK")
</pallas_src>

<mosaic_0001>
module attributes {stable_mosaic.version = 11 : i64} {
  func.func @distance_lstm_kernel(%arg0: memref<8x16x1xf32, #tpu.memory_space<vmem>>, %arg1: memref<1x512xf32, #tpu.memory_space<vmem>>, %arg2: memref<1x512xf32, #tpu.memory_space<vmem>>, %arg3: memref<128x512xbf16, #tpu.memory_space<vmem>>, %arg4: memref<1x512xf32, #tpu.memory_space<vmem>>, %arg5: memref<1x64xf32, #tpu.memory_space<vmem>>, %arg6: memref<1x1xf32, #tpu.memory_space<vmem>>, %arg7: memref<16x1xf32, #tpu.memory_space<vmem>>) attributes {dimension_semantics = [], scalar_prefetch = 0 : i64, scratch_operands = 0 : i64, tpu.core_type = #tpu.core_type<tc>} {
    %c0 = arith.constant 0 : index
    %c0_0 = arith.constant 0 : index
    %0 = vector.load %arg3[%c0, %c0_0] : memref<128x512xbf16, #tpu.memory_space<vmem>>, vector<128x512xbf16>
    %c0_1 = arith.constant 0 : index
    %c0_2 = arith.constant 0 : index
    %1 = vector.load %arg4[%c0_1, %c0_2] : memref<1x512xf32, #tpu.memory_space<vmem>>, vector<1x512xf32>
    %c0_3 = arith.constant 0 : index
    %c0_4 = arith.constant 0 : index
    %c0_5 = arith.constant 0 : index
    %2 = vector.load %arg0[%c0_3, %c0_4, %c0_5] : memref<8x16x1xf32, #tpu.memory_space<vmem>>, vector<8x16x1xf32>
    %c0_6 = arith.constant 0 : index
    %c0_7 = arith.constant 0 : index
    %3 = vector.load %arg1[%c0_6, %c0_7] : memref<1x512xf32, #tpu.memory_space<vmem>>, vector<1x512xf32>
    %4 = vector.shape_cast %3 : vector<1x512xf32> to vector<1x1x512xf32>
    %5 = vector.broadcast %2 : vector<8x16x1xf32> to vector<8x16x512xf32>
    %6 = vector.broadcast %4 : vector<1x1x512xf32> to vector<8x16x512xf32>
    %7 = arith.mulf %5, %6 : vector<8x16x512xf32>
    %c0_8 = arith.constant 0 : index
    %c0_9 = arith.constant 0 : index
    %8 = vector.load %arg2[%c0_8, %c0_9] : memref<1x512xf32, #tpu.memory_space<vmem>>, vector<1x512xf32>
    %9 = vector.shape_cast %8 : vector<1x512xf32> to vector<1x1x512xf32>
    %10 = vector.broadcast %9 : vector<1x1x512xf32> to vector<8x16x512xf32>
    %11 = arith.addf %7, %10 : vector<8x16x512xf32>
    %12 = vector.shape_cast %1 : vector<1x512xf32> to vector<1x1x512xf32>
    %13 = vector.broadcast %12 : vector<1x1x512xf32> to vector<8x16x512xf32>
    %14 = arith.addf %11, %13 : vector<8x16x512xf32>
    %15 = vector.extract_strided_slice %11 {offsets = [0, 0, 0], sizes = [1, 16, 512], strides = [1, 1, 1]} : vector<8x16x512xf32> to vector<1x16x512xf32>
    %16 = vector.shape_cast %15 : vector<1x16x512xf32> to vector<16x512xf32>
    %cst = arith.constant 0.000000e+00 : f32
    %17 = vector.broadcast %cst : f32 to vector<16x128xf32>
    %18 = vector.extract_strided_slice %16 {offsets = [0, 0], sizes = [16, 384], strides = [1, 1]} : vector<16x512xf32> to vector<16x384xf32>
    %19 = arith.negf %18 : vector<16x384xf32>
    %20 = math.exp %19 : vector<16x384xf32>
    %cst_10 = arith.constant 1.000000e+00 : f32
    %21 = vector.broadcast %cst_10 : f32 to vector<16x384xf32>
    %22 = arith.addf %21, %20 : vector<16x384xf32>
    %23 = arith.divf %21, %22 : vector<16x384xf32>
    %24 = vector.extract_strided_slice %23 {offsets = [0, 0], sizes = [16, 128], strides = [1, 1]} : vector<16x384xf32> to vector<16x128xf32>
    %25 = vector.extract_strided_slice %23 {offsets = [0, 128], sizes = [16, 128], strides = [1, 1]} : vector<16x384xf32> to vector<16x128xf32>
    %26 = vector.extract_strided_slice %23 {offsets = [0, 256], sizes = [16, 128], strides = [1, 1]} : vector<16x384xf32> to vector<16x128xf32>
    %27 = vector.extract_strided_slice %16 {offsets = [0, 384], sizes = [16, 128], strides = [1, 1]} : vector<16x512xf32> to vector<16x128xf32>
    %28 = math.tanh %27 : vector<16x128xf32>
    %29 = arith.mulf %25, %17 : vector<16x128xf32>
    %30 = arith.mulf %24, %28 : vector<16x128xf32>
    %31 = arith.addf %29, %30 : vector<16x128xf32>
    %32 = math.tanh %31 : vector<16x128xf32>
    %33 = arith.mulf %26, %32 : vector<16x128xf32>
    %34 = arith.truncf %33 : vector<16x128xf32> to vector<16x128xbf16>
    %cst_11 = arith.constant dense<0.000000e+00> : vector<16x512xf32>
    %35 = tpu.matmul %34, %0, %cst_11 {dimension_numbers = #tpu.dot_dimension_numbers<[1], [0], [0], [1], [0, 0, 1, 1], [], []>} : vector<16x128xbf16>, vector<128x512xbf16>, vector<16x512xf32> -> vector<16x512xf32>
    %36 = vector.extract_strided_slice %14 {offsets = [1, 0, 0], sizes = [1, 16, 512], strides = [1, 1, 1]} : vector<8x16x512xf32> to vector<1x16x512xf32>
    %37 = vector.shape_cast %36 : vector<1x16x512xf32> to vector<16x512xf32>
    %38 = arith.addf %35, %37 : vector<16x512xf32>
    %39 = vector.extract_strided_slice %38 {offsets = [0, 0], sizes = [16, 384], strides = [1, 1]} : vector<16x512xf32> to vector<16x384xf32>
    %40 = arith.negf %39 : vector<16x384xf32>
    %41 = math.exp %40 : vector<16x384xf32>
    %cst_12 = arith.constant 1.000000e+00 : f32
    %42 = vector.broadcast %cst_12 : f32 to vector<16x384xf32>
    %43 = arith.addf %42, %41 : vector<16x384xf32>
    %44 = arith.divf %42, %43 : vector<16x384xf32>
    %45 = vector.extract_strided_slice %44 {offsets = [0, 0], sizes = [16, 128], strides = [1, 1]} : vector<16x384xf32> to vector<16x128xf32>
    %46 = vector.extract_strided_slice %44 {offsets = [0, 128], sizes = [16, 128], strides = [1, 1]} : vector<16x384xf32> to vector<16x128xf32>
    %47 = vector.extract_strided_slice %44 {offsets = [0, 256], sizes = [16, 128], strides = [1, 1]} : vector<16x384xf32> to vector<16x128xf32>
    %48 = vector.extract_strided_slice %38 {offsets = [0, 384], sizes = [16, 128], strides = [1, 1]} : vector<16x512xf32> to vector<16x128xf32>
    %49 = math.tanh %48 : vector<16x128xf32>
    %50 = arith.mulf %46, %31 : vector<16x128xf32>
    %51 = arith.mulf %45, %49 : vector<16x128xf32>
    %52 = arith.addf %50, %51 : vector<16x128xf32>
    %53 = math.tanh %52 : vector<16x128xf32>
    %54 = arith.mulf %47, %53 : vector<16x128xf32>
    %55 = arith.truncf %54 : vector<16x128xf32> to vector<16x128xbf16>
    %cst_13 = arith.constant dense<0.000000e+00> : vector<16x512xf32>
    %56 = tpu.matmul %55, %0, %cst_13 {dimension_numbers = #tpu.dot_dimension_numbers<[1], [0], [0], [1], [0, 0, 1, 1], [], []>} : vector<16x128xbf16>, vector<128x512xbf16>, vector<16x512xf32> -> vector<16x512xf32>
    %57 = vector.extract_strided_slice %14 {offsets = [2, 0, 0], sizes = [1, 16, 512], strides = [1, 1, 1]} : vector<8x16x512xf32> to vector<1x16x512xf32>
    %58 = vector.shape_cast %57 : vector<1x16x512xf32> to vector<16x512xf32>
    %59 = arith.addf %56, %58 : vector<16x512xf32>
    %60 = vector.extract_strided_slice %59 {offsets = [0, 0], sizes = [16, 384], strides = [1, 1]} : vector<16x512xf32> to vector<16x384xf32>
    %61 = arith.negf %60 : vector<16x384xf32>
    %62 = math.exp %61 : vector<16x384xf32>
    %cst_14 = arith.constant 1.000000e+00 : f32
    %63 = vector.broadcast %cst_14 : f32 to vector<16x384xf32>
    %64 = arith.addf %63, %62 : vector<16x384xf32>
    %65 = arith.divf %63, %64 : vector<16x384xf32>
    %66 = vector.extract_strided_slice %65 {offsets = [0, 0], sizes = [16, 128], strides = [1, 1]} : vector<16x384xf32> to vector<16x128xf32>
    %67 = vector.extract_strided_slice %65 {offsets = [0, 128], sizes = [16, 128], strides = [1, 1]} : vector<16x384xf32> to vector<16x128xf32>
    %68 = vector.extract_strided_slice %65 {offsets = [0, 256], sizes = [16, 128], strides = [1, 1]} : vector<16x384xf32> to vector<16x128xf32>
    %69 = vector.extract_strided_slice %59 {offsets = [0, 384], sizes = [16, 128], strides = [1, 1]} : vector<16x512xf32> to vector<16x128xf32>
    %70 = math.tanh %69 : vector<16x128xf32>
    %71 = arith.mulf %67, %52 : vector<16x128xf32>
    %72 = arith.mulf %66, %70 : vector<16x128xf32>
    %73 = arith.addf %71, %72 : vector<16x128xf32>
    %74 = math.tanh %73 : vector<16x128xf32>
    %75 = arith.mulf %68, %74 : vector<16x128xf32>
    %76 = arith.truncf %75 : vector<16x128xf32> to vector<16x128xbf16>
    %cst_15 = arith.constant dense<0.000000e+00> : vector<16x512xf32>
    %77 = tpu.matmul %76, %0, %cst_15 {dimension_numbers = #tpu.dot_dimension_numbers<[1], [0], [0], [1], [0, 0, 1, 1], [], []>} : vector<16x128xbf16>, vector<128x512xbf16>, vector<16x512xf32> -> vector<16x512xf32>
    %78 = vector.extract_strided_slice %14 {offsets = [3, 0, 0], sizes = [1, 16, 512], strides = [1, 1, 1]} : vector<8x16x512xf32> to vector<1x16x512xf32>
    %79 = vector.shape_cast %78 : vector<1x16x512xf32> to vector<16x512xf32>
    %80 = arith.addf %77, %79 : vector<16x512xf32>
    %81 = vector.extract_strided_slice %80 {offsets = [0, 0], sizes = [16, 384], strides = [1, 1]} : vector<16x512xf32> to vector<16x384xf32>
    %82 = arith.negf %81 : vector<16x384xf32>
    %83 = math.exp %82 : vector<16x384xf32>
    %cst_16 = arith.constant 1.000000e+00 : f32
    %84 = vector.broadcast %cst_16 : f32 to vector<16x384xf32>
    %85 = arith.addf %84, %83 : vector<16x384xf32>
    %86 = arith.divf %84, %85 : vector<16x384xf32>
    %87 = vector.extract_strided_slice %86 {offsets = [0, 0], sizes = [16, 128], strides = [1, 1]} : vector<16x384xf32> to vector<16x128xf32>
    %88 = vector.extract_strided_slice %86 {offsets = [0, 128], sizes = [16, 128], strides = [1, 1]} : vector<16x384xf32> to vector<16x128xf32>
    %89 = vector.extract_strided_slice %86 {offsets = [0, 256], sizes = [16, 128], strides = [1, 1]} : vector<16x384xf32> to vector<16x128xf32>
    %90 = vector.extract_strided_slice %80 {offsets = [0, 384], sizes = [16, 128], strides = [1, 1]} : vector<16x512xf32> to vector<16x128xf32>
    %91 = math.tanh %90 : vector<16x128xf32>
    %92 = arith.mulf %88, %73 : vector<16x128xf32>
    %93 = arith.mulf %87, %91 : vector<16x128xf32>
    %94 = arith.addf %92, %93 : vector<16x128xf32>
    %95 = math.tanh %94 : vector<16x128xf32>
    %96 = arith.mulf %89, %95 : vector<16x128xf32>
    %97 = arith.truncf %96 : vector<16x128xf32> to vector<16x128xbf16>
    %cst_17 = arith.constant dense<0.000000e+00> : vector<16x512xf32>
    %98 = tpu.matmul %97, %0, %cst_17 {dimension_numbers = #tpu.dot_dimension_numbers<[1], [0], [0], [1], [0, 0, 1, 1], [], []>} : vector<16x128xbf16>, vector<128x512xbf16>, vector<16x512xf32> -> vector<16x512xf32>
    %99 = vector.extract_strided_slice %14 {offsets = [4, 0, 0], sizes = [1, 16, 512], strides = [1, 1, 1]} : vector<8x16x512xf32> to vector<1x16x512xf32>
    %100 = vector.shape_cast %99 : vector<1x16x512xf32> to vector<16x512xf32>
    %101 = arith.addf %98, %100 : vector<16x512xf32>
    %102 = vector.extract_strided_slice %101 {offsets = [0, 0], sizes = [16, 384], strides = [1, 1]} : vector<16x512xf32> to vector<16x384xf32>
    %103 = arith.negf %102 : vector<16x384xf32>
    %104 = math.exp %103 : vector<16x384xf32>
    %cst_18 = arith.constant 1.000000e+00 : f32
    %105 = vector.broadcast %cst_18 : f32 to vector<16x384xf32>
    %106 = arith.addf %105, %104 : vector<16x384xf32>
    %107 = arith.divf %105, %106 : vector<16x384xf32>
    %108 = vector.extract_strided_slice %107 {offsets = [0, 0], sizes = [16, 128], strides = [1, 1]} : vector<16x384xf32> to vector<16x128xf32>
    %109 = vector.extract_strided_slice %107 {offsets = [0, 128], sizes = [16, 128], strides = [1, 1]} : vector<16x384xf32> to vector<16x128xf32>
    %110 = vector.extract_strided_slice %107 {offsets = [0, 256], sizes = [16, 128], strides = [1, 1]} : vector<16x384xf32> to vector<16x128xf32>
    %111 = vector.extract_strided_slice %101 {offsets = [0, 384], sizes = [16, 128], strides = [1, 1]} : vector<16x512xf32> to vector<16x128xf32>
    %112 = math.tanh %111 : vector<16x128xf32>
    %113 = arith.mulf %109, %94 : vector<16x128xf32>
    %114 = arith.mulf %108, %112 : vector<16x128xf32>
    %115 = arith.addf %113, %114 : vector<16x128xf32>
    %116 = math.tanh %115 : vector<16x128xf32>
    %117 = arith.mulf %110, %116 : vector<16x128xf32>
    %118 = arith.truncf %117 : vector<16x128xf32> to vector<16x128xbf16>
    %cst_19 = arith.constant dense<0.000000e+00> : vector<16x512xf32>
    %119 = tpu.matmul %118, %0, %cst_19 {dimension_numbers = #tpu.dot_dimension_numbers<[1], [0], [0], [1], [0, 0, 1, 1], [], []>} : vector<16x128xbf16>, vector<128x512xbf16>, vector<16x512xf32> -> vector<16x512xf32>
    %120 = vector.extract_strided_slice %14 {offsets = [5, 0, 0], sizes = [1, 16, 512], strides = [1, 1, 1]} : vector<8x16x512xf32> to vector<1x16x512xf32>
    %121 = vector.shape_cast %120 : vector<1x16x512xf32> to vector<16x512xf32>
    %122 = arith.addf %119, %121 : vector<16x512xf32>
    %123 = vector.extract_strided_slice %122 {offsets = [0, 0], sizes = [16, 384], strides = [1, 1]} : vector<16x512xf32> to vector<16x384xf32>
    %124 = arith.negf %123 : vector<16x384xf32>
    %125 = math.exp %124 : vector<16x384xf32>
    %cst_20 = arith.constant 1.000000e+00 : f32
    %126 = vector.broadcast %cst_20 : f32 to vector<16x384xf32>
    %127 = arith.addf %126, %125 : vector<16x384xf32>
    %128 = arith.divf %126, %127 : vector<16x384xf32>
    %129 = vector.extract_strided_slice %128 {offsets = [0, 0], sizes = [16, 128], strides = [1, 1]} : vector<16x384xf32> to vector<16x128xf32>
    %130 = vector.extract_strided_slice %128 {offsets = [0, 128], sizes = [16, 128], strides = [1, 1]} : vector<16x384xf32> to vector<16x128xf32>
    %131 = vector.extract_strided_slice %128 {offsets = [0, 256], sizes = [16, 128], strides = [1, 1]} : vector<16x384xf32> to vector<16x128xf32>
    %132 = vector.extract_strided_slice %122 {offsets = [0, 384], sizes = [16, 128], strides = [1, 1]} : vector<16x512xf32> to vector<16x128xf32>
    %133 = math.tanh %132 : vector<16x128xf32>
    %134 = arith.mulf %130, %115 : vector<16x128xf32>
    %135 = arith.mulf %129, %133 : vector<16x128xf32>
    %136 = arith.addf %134, %135 : vector<16x128xf32>
    %137 = math.tanh %136 : vector<16x128xf32>
    %138 = arith.mulf %131, %137 : vector<16x128xf32>
    %139 = arith.truncf %138 : vector<16x128xf32> to vector<16x128xbf16>
    %cst_21 = arith.constant dense<0.000000e+00> : vector<16x512xf32>
    %140 = tpu.matmul %139, %0, %cst_21 {dimension_numbers = #tpu.dot_dimension_numbers<[1], [0], [0], [1], [0, 0, 1, 1], [], []>} : vector<16x128xbf16>, vector<128x512xbf16>, vector<16x512xf32> -> vector<16x512xf32>
    %141 = vector.extract_strided_slice %14 {offsets = [6, 0, 0], sizes = [1, 16, 512], strides = [1, 1, 1]} : vector<8x16x512xf32> to vector<1x16x512xf32>
    %142 = vector.shape_cast %141 : vector<1x16x512xf32> to vector<16x512xf32>
    %143 = arith.addf %140, %142 : vector<16x512xf32>
    %144 = vector.extract_strided_slice %143 {offsets = [0, 0], sizes = [16, 384], strides = [1, 1]} : vector<16x512xf32> to vector<16x384xf32>
    %145 = arith.negf %144 : vector<16x384xf32>
    %146 = math.exp %145 : vector<16x384xf32>
    %cst_22 = arith.constant 1.000000e+00 : f32
    %147 = vector.broadcast %cst_22 : f32 to vector<16x384xf32>
    %148 = arith.addf %147, %146 : vector<16x384xf32>
    %149 = arith.divf %147, %148 : vector<16x384xf32>
    %150 = vector.extract_strided_slice %149 {offsets = [0, 0], sizes = [16, 128], strides = [1, 1]} : vector<16x384xf32> to vector<16x128xf32>
    %151 = vector.extract_strided_slice %149 {offsets = [0, 128], sizes = [16, 128], strides = [1, 1]} : vector<16x384xf32> to vector<16x128xf32>
    %152 = vector.extract_strided_slice %149 {offsets = [0, 256], sizes = [16, 128], strides = [1, 1]} : vector<16x384xf32> to vector<16x128xf32>
    %153 = vector.extract_strided_slice %143 {offsets = [0, 384], sizes = [16, 128], strides = [1, 1]} : vector<16x512xf32> to vector<16x128xf32>
    %154 = math.tanh %153 : vector<16x128xf32>
    %155 = arith.mulf %151, %136 : vector<16x128xf32>
    %156 = arith.mulf %150, %154 : vector<16x128xf32>
    %157 = arith.addf %155, %156 : vector<16x128xf32>
    %158 = math.tanh %157 : vector<16x128xf32>
    %159 = arith.mulf %152, %158 : vector<16x128xf32>
    %160 = arith.truncf %159 : vector<16x128xf32> to vector<16x128xbf16>
    %cst_23 = arith.constant dense<0.000000e+00> : vector<16x512xf32>
    %161 = tpu.matmul %160, %0, %cst_23 {dimension_numbers = #tpu.dot_dimension_numbers<[1], [0], [0], [1], [0, 0, 1, 1], [], []>} : vector<16x128xbf16>, vector<128x512xbf16>, vector<16x512xf32> -> vector<16x512xf32>
    %162 = vector.extract_strided_slice %14 {offsets = [7, 0, 0], sizes = [1, 16, 512], strides = [1, 1, 1]} : vector<8x16x512xf32> to vector<1x16x512xf32>
    %163 = vector.shape_cast %162 : vector<1x16x512xf32> to vector<16x512xf32>
    %164 = arith.addf %161, %163 : vector<16x512xf32>
    %165 = vector.extract_strided_slice %164 {offsets = [0, 0], sizes = [16, 384], strides = [1, 1]} : vector<16x512xf32> to vector<16x384xf32>
    %166 = arith.negf %165 : vector<16x384xf32>
    %167 = math.exp %166 : vector<16x384xf32>
    %cst_24 = arith.constant 1.000000e+00 : f32
    %168 = vector.broadcast %cst_24 : f32 to vector<16x384xf32>
    %169 = arith.addf %168, %167 : vector<16x384xf32>
    %170 = arith.divf %168, %169 : vector<16x384xf32>
    %171 = vector.extract_strided_slice %170 {offsets = [0, 0], sizes = [16, 128], strides = [1, 1]} : vector<16x384xf32> to vector<16x128xf32>
    %172 = vector.extract_strided_slice %170 {offsets = [0, 128], sizes = [16, 128], strides = [1, 1]} : vector<16x384xf32> to vector<16x128xf32>
    %173 = vector.extract_strided_slice %170 {offsets = [0, 256], sizes = [16, 128], strides = [1, 1]} : vector<16x384xf32> to vector<16x128xf32>
    %174 = vector.extract_strided_slice %164 {offsets = [0, 384], sizes = [16, 128], strides = [1, 1]} : vector<16x512xf32> to vector<16x128xf32>
    %175 = math.tanh %174 : vector<16x128xf32>
    %176 = arith.mulf %172, %157 : vector<16x128xf32>
    %177 = arith.mulf %171, %175 : vector<16x128xf32>
    %178 = arith.addf %176, %177 : vector<16x128xf32>
    %179 = math.tanh %178 : vector<16x128xf32>
    %180 = arith.mulf %173, %179 : vector<16x128xf32>
    %181 = arith.truncf %180 : vector<16x128xf32> to vector<16x128xbf16>
    %cst_25 = arith.constant dense<0.000000e+00> : vector<16x512xf32>
    %182 = tpu.matmul %181, %0, %cst_25 {dimension_numbers = #tpu.dot_dimension_numbers<[1], [0], [0], [1], [0, 0, 1, 1], [], []>} : vector<16x128xbf16>, vector<128x512xbf16>, vector<16x512xf32> -> vector<16x512xf32>
    %183 = vector.broadcast %1 : vector<1x512xf32> to vector<16x512xf32>
    %184 = arith.addf %182, %183 : vector<16x512xf32>
    %185 = vector.extract_strided_slice %184 {offsets = [0, 0], sizes = [16, 384], strides = [1, 1]} : vector<16x512xf32> to vector<16x384xf32>
    %186 = arith.negf %185 : vector<16x384xf32>
    %187 = math.exp %186 : vector<16x384xf32>
    %cst_26 = arith.constant 1.000000e+00 : f32
    %188 = vector.broadcast %cst_26 : f32 to vector<16x384xf32>
    %189 = arith.addf %188, %187 : vector<16x384xf32>
    %190 = arith.divf %188, %189 : vector<16x384xf32>
    %191 = vector.extract_strided_slice %190 {offsets = [0, 0], sizes = [16, 128], strides = [1, 1]} : vector<16x384xf32> to vector<16x128xf32>
    %192 = vector.extract_strided_slice %190 {offsets = [0, 128], sizes = [16, 128], strides = [1, 1]} : vector<16x384xf32> to vector<16x128xf32>
    %193 = vector.extract_strided_slice %190 {offsets = [0, 256], sizes = [16, 128], strides = [1, 1]} : vector<16x384xf32> to vector<16x128xf32>
    %194 = vector.extract_strided_slice %184 {offsets = [0, 384], sizes = [16, 128], strides = [1, 1]} : vector<16x512xf32> to vector<16x128xf32>
    %195 = math.tanh %194 : vector<16x128xf32>
    %196 = arith.mulf %192, %178 : vector<16x128xf32>
    %197 = arith.mulf %191, %195 : vector<16x128xf32>
    %198 = arith.addf %196, %197 : vector<16x128xf32>
    %199 = math.tanh %198 : vector<16x128xf32>
    %200 = arith.mulf %193, %199 : vector<16x128xf32>
    %201 = vector.extract_strided_slice %200 {offsets = [0, 64], sizes = [16, 64], strides = [1, 1]} : vector<16x128xf32> to vector<16x64xf32>
    %c0_27 = arith.constant 0 : index
    %c0_28 = arith.constant 0 : index
    %202 = vector.load %arg5[%c0_27, %c0_28] : memref<1x64xf32, #tpu.memory_space<vmem>>, vector<1x64xf32>
    %203 = vector.broadcast %202 : vector<1x64xf32> to vector<16x64xf32>
    %204 = arith.mulf %201, %203 : vector<16x64xf32>
    %cst_29 = arith.constant dense<0.000000e+00> : vector<16xf32>
    %205 = vector.multi_reduction <add>, %204, %cst_29 [1] : vector<16x64xf32> to vector<16xf32>
    %206 = vector.shape_cast %205 : vector<16xf32> to vector<16x1xf32>
    %c0_30 = arith.constant 0 : index
    %c0_31 = arith.constant 0 : index
    %207 = vector.load %arg6[%c0_30, %c0_31] : memref<1x1xf32, #tpu.memory_space<vmem>>, vector<1x1xf32>
    %208 = vector.broadcast %207 : vector<1x1xf32> to vector<16x1xf32>
    %209 = arith.addf %206, %208 : vector<16x1xf32>
    %c0_32 = arith.constant 0 : index
    %c0_33 = arith.constant 0 : index
    %210 = vector.load %arg7[%c0_32, %c0_33] : memref<16x1xf32, #tpu.memory_space<vmem>>, vector<16x1xf32>
    tpu.vector_store %arg7[%c0_32, %c0_33], %209 {strides = array<i32>} : memref<16x1xf32, #tpu.memory_space<vmem>>, vector<16x1xf32>,
    return
  }
}

</mosaic_0001>

<bundles_post_ra>
// kernel: tpu_custom_call.1
= control target key start
LH: loop header
LB: loop body
LE: loop exit
PB: predicated region body
PF: predicated region fallthrough
CT: control target
= control target key end

     0   :  { %s3059_s0 = inlined_call_operand.vmem [shape: f32[8,16,1], index: 0, kind: input, shape index: {}]   ;;  %s3060_s1 = inlined_call_operand.vmem [shape: f32[1,512], index: 1, kind: input, shape index: {}]   ;;  %s3061_s2 = inlined_call_operand.vmem [shape: f32[1,512], index: 2, kind: input, shape index: {}]   ;;  %s3062_s3 = inlined_call_operand.hbm [shape: bf16[128,512], index: 3, kind: input, shape index: {}]   ;;  %s3063_s4 = inlined_call_operand.vmem [shape: f32[1,512], index: 4, kind: input, shape index: {}]   ;;  %s3064_s5 = inlined_call_operand.vmem [shape: f32[1,64], index: 5, kind: input, shape index: {}]   ;;  %s3065_s6 = inlined_call_operand.<no memory space> [shape: f32[1,1], index: 6, kind: input, shape index: {}]   ;;  %s3066_s7 = inlined_call_operand.vmem [shape: f32[16,1], index: 7, kind: output, shape index: {}]  }
   0x1   :  { %v12_v0 = vstv %s3065_s6 }
   0x2   :  { %13 = vst [vmem:[#allocation2] sm:$0x1] %v12_v0 }
   0x3   :  { %14 = vsyncpa [#allocation4], 0  ;;  %s2237_s26 = smov [#allocation3]  }
   0x4   :  { %s26_s27 = sshll.u32 %s2237_s26, 4  ;;  %s27_s27 = int_to_ptr.vmem [resolvable:$true] %s26_s27 }
   0x5   :  { %s2223_s28 = scalar_lea.vmem %s27_s27, 4096  ;;  %p2228_p1 = scmp.lt.s32.totalorder %s27_s27, %s27_s27 }
   0x6   :  { %p2224_p0 = scmp.ne.s32.totalorder %s27_s27, %s2223_s28  ;;  %p2229_p2 = scmp.lt.s32.totalorder %s2223_s28, %s2223_s28 }
   0x8   :  { %p2230_p3 = por %p2229_p2, %p2228_p1 }
   0xa   :  { %p2231_p4 = pnand %p2230_p3, %p2224_p0 }
   0xc   :  { %2234 = shalt.err (!%p2231_p4)
}
   0xd   :  { %s2238_s29 = smov 256   ;;  %s2239_s30 = smov 16  }
   0xe   :  { %32 = dma.hbm_to_vmem [thread:$0]  %s3062_s3, 4096, %s27_s27, [#allocation4], %s2238_s29, %s2238_s29, %s2239_s30  }
   0xf   :  { %2235 = dma.done.wait [#allocation4], 4096  }
  0x10   :  { %2236 = vsyncadd [#allocation4], 4294963200  ;;  %v3067_v1 = vmov 0   ;;  %v76_v2 = vld [vmem:[%s3059_s0] sm:$0xff]  ;;  %v77_v3 = vld [vmem:[%s3059_s0 + $0x8] sm:$0xff]  ;;  %v174_v50 = vlaneseq  ;;  %s2241_s19 = smov 64  }
  0x11   :  { %1845 = vset.pattern.permute.xlu0 %v3067_v1  ;;  %662 = vmatprep.mubr.bf16.mxu0 %v3067_v1  ;;  %v80_v4 = vld [vmem:[%s3059_s0 + $0x20] sm:$0xff]  ;;  %v82_v5 = vld [vmem:[%s3059_s0 + $0x30] sm:$0xff]  ;;  %v2322_v13 = vld [vmem:[#allocation3 + $0xe8] ss:$16 sps:$4 sm:$0xff]   ;;  %vm1728_vm0 = vcmask 523264   ;;  %vm1744_vm1 = vcmask 7168  }
  0x12   :  { %705 = vmatprep.mubr.bf16.mxu1 %v3067_v1  ;;  %1846 = vset.pattern.permute.xlu1 %v3067_v1  ;;  %v84_v6 = vld [vmem:[%s3059_s0 + $0x40] sm:$0xff]  ;;  %v86_v7 = vld [vmem:[%s3059_s0 + $0x50] sm:$0xff]  ;;  %v2334_v17 = vld [vmem:[#allocation3 + $0xc8] ss:$16 sps:$4 sm:$0xff]   ;;  %v175_v51 = vshrl.u32 %v174_v50, 7 }
  0x13   :  { %95 = vperm.xlu0 %1845, %v76_v2   ;;  %v88_v8 = vld [vmem:[%s3059_s0 + $0x60] sm:$0xff]  ;;  %v90_v9 = vld [vmem:[%s3059_s0 + $0x70] sm:$0xff]  ;;  %v2346_v21 = vld [vmem:[#allocation3 + $0xa8] ss:$16 sps:$4 sm:$0xff]  }
  0x14   :  { %v2316_v10 = vld [vmem:[#allocation3 + $0xe4] ss:$16 sps:$4 sm:$0xff]   ;;  %v2318_v11 = vld [vmem:[#allocation3 + $0xec] ss:$16 sps:$4 sm:$0xff]   ;;  %v2320_v12 = vld [vmem:[#allocation3 + $0xe0] ss:$16 sps:$4 sm:$0xff]  }
  0x15   :  { %3091 = vst [vmem:[#allocation6_spill] sm:$0xff] %v2318_v11  ;;  %630 = vmatprep.subr.bf16.mxu0 %v2316_v10  ;;  %673 = vmatprep.subr.bf16.mxu1 %v2318_v11  ;;  %v2328_v14 = vld [vmem:[#allocation3 + $0xc4] ss:$16 sps:$4 sm:$0xff]   ;;  %v2330_v15 = vld [vmem:[#allocation3 + $0xcc] ss:$16 sps:$4 sm:$0xff]   ;;  %v2438_v52 = vsub.s32 0, %v175_v51 }
  0x16   :  { %631 = vmatpush1.bf16.msra.mxu0 %v2320_v12  ;;  %674 = vmatpush1.bf16.msra.mxu1 %v2322_v13  ;;  %v2332_v16 = vld [vmem:[#allocation3 + $0xc0] ss:$16 sps:$4 sm:$0xff]   ;;  %v2340_v18 = vld [vmem:[#allocation3 + $0xa4] ss:$16 sps:$4 sm:$0xff]   ;;  %v2342_v19 = vld [vmem:[#allocation3 + $0xac] ss:$16 sps:$4 sm:$0xff]  }
  0x17   :  { %100 = vperm.xlu0 %1845, %v77_v3   ;;  %632 = vmatprep.subr.bf16.mxu0 %v2328_v14  ;;  %v2344_v20 = vld [vmem:[#allocation3 + $0xa0] ss:$16 sps:$4 sm:$0xff]   ;;  %v2352_v22 = vld [vmem:[#allocation3 + $0x84] ss:$16 sps:$4 sm:$0xff]   ;;  %v2354_v23 = vld [vmem:[#allocation3 + $0x8c] ss:$16 sps:$4 sm:$0xff]  }
  0x18   :  { %675 = vmatprep.subr.bf16.mxu1 %v2330_v15  ;;  %v2356_v24 = vld [vmem:[#allocation3 + $0x80] ss:$16 sps:$4 sm:$0xff]   ;;  %v2358_v25 = vld [vmem:[#allocation3 + $0x88] ss:$16 sps:$4 sm:$0xff]   ;;  %v2360_v26 = vld [vmem:[#allocation3 + $0x64] ss:$16 sps:$4 sm:$0xff]  }
  0x19   :  { %v2364_v27 = vld [vmem:[#allocation3 + $0x6c] ss:$16 sps:$4 sm:$0xff]   ;;  %v2368_v28 = vld [vmem:[#allocation3 + $0x60] ss:$16 sps:$4 sm:$0xff]   ;;  %v2370_v29 = vld [vmem:[#allocation3 + $0x68] ss:$16 sps:$4 sm:$0xff]  }
  0x1a   :  { %633 = vmatpush1.bf16.msra.mxu0 %v2332_v16  ;;  %676 = vmatpush1.bf16.msra.mxu1 %v2334_v17  ;;  %v2374_v30 = vld [vmem:[#allocation3 + $0x44] ss:$16 sps:$4 sm:$0xff]   ;;  %v2376_v31 = vld [vmem:[#allocation3 + $0x4c] ss:$16 sps:$4 sm:$0xff]   ;;  %v2380_v32 = vld [vmem:[#allocation3 + $0x40] ss:$16 sps:$4 sm:$0xff]  }
  0x1b   :  { %115 = vperm.xlu0 %1845, %v80_v4   ;;  %634 = vmatprep.subr.bf16.mxu0 %v2340_v18  ;;  %v2382_v33 = vld [vmem:[#allocation3 + $0x48] ss:$16 sps:$4 sm:$0xff]   ;;  %v2386_v34 = vld [vmem:[#allocation3 + $0x24] ss:$16 sps:$4 sm:$0xff]   ;;  %v2388_v35 = vld [vmem:[#allocation3 + $0x2c] ss:$16 sps:$4 sm:$0xff]  }
  0x1c   :  { %677 = vmatprep.subr.bf16.mxu1 %v2342_v19  ;;  %v2392_v36 = vld [vmem:[#allocation3 + $0x20] ss:$16 sps:$4 sm:$0xff]   ;;  %v2394_v37 = vld [vmem:[#allocation3 + $0x28] ss:$16 sps:$4 sm:$0xff]   ;;  %v2398_v38 = vld [vmem:[#allocation3 + $0x4] ss:$16 sps:$4 sm:$0xff]  }
  0x1d   :  { %v2400_v39 = vld [vmem:[#allocation3 + $0xc] ss:$16 sps:$4 sm:$0xff]   ;;  %v2404_v40 = vld [vmem:[#allocation3] ss:$16 sps:$4 sm:$0xff]   ;;  %v2406_v41 = vld [vmem:[#allocation3 + $0x8] ss:$16 sps:$4 sm:$0xff]  }
  0x1e   :  { %635 = vmatpush1.bf16.msra.mxu0 %v2344_v20  ;;  %678 = vmatpush1.bf16.msra.mxu1 %v2346_v21  ;;  %v78_v42 = vld [vmem:[%s3059_s0 + $0x10] sm:$0xff]  ;;  %v79_v43 = vld [vmem:[%s3059_s0 + $0x18] sm:$0xff]  ;;  %v81_v44 = vld [vmem:[%s3059_s0 + $0x28] sm:$0xff]  ;;  %v2440_v53 = vsub.s32 1, %v175_v51  ;;  %v2462_v63 = vsub.s32 2, %v175_v51  ;;  %v2466_v4 = vsub.s32 3, %v175_v51 }
  0x1f   :  { %125 = vperm.xlu0 %1845, %v82_v5   ;;  %636 = vmatprep.subr.bf16.mxu0 %v2352_v22  ;;  %v83_v45 = vld [vmem:[%s3059_s0 + $0x38] sm:$0xff]  ;;  %v85_v46 = vld [vmem:[%s3059_s0 + $0x48] sm:$0xff]  ;;  %v92_v54 = vld [vmem:[%s3060_s1] sm:$0xf] }
  0x20   :  { %679 = vmatprep.subr.bf16.mxu1 %v2354_v23  ;;  %105 = vperm.xlu1 %1846, %v78_v42   ;;  %v87_v47 = vld [vmem:[%s3059_s0 + $0x58] sm:$0xff]  ;;  %v89_v48 = vld [vmem:[%s3059_s0 + $0x68] sm:$0xff]  ;;  %v258_v55 = vld [vmem:[%s3061_s2] sm:$0xf]  ;;  %v2449_v56 = vrot.slane %v92_v54, %v2438_v52  ;;  %v2452_v57 = vrot.slane %v92_v54, %v2440_v53 }
  0x21   :  { %v91_v49 = vld [vmem:[%s3059_s0 + $0x78] sm:$0xff]  ;;  %v2455_v58 = vrot.slane %v258_v55, %v2438_v52  ;;  %v2458_v59 = vrot.slane %v258_v55, %v2440_v53 }
  0x22   :  { %637 = vmatpush1.bf16.msra.mxu0 %v2356_v24  ;;  %680 = vmatpush1.bf16.msra.mxu1 %v2358_v25  ;;  %3092 = vst [vmem:[#allocation7_spill] sm:$0xff] %v2449_v56  ;;  %3093 = vst [vmem:[#allocation8_spill] sm:$0xff] %v2452_v57 }
  0x23   :  { %135 = vperm.xlu0 %1845, %v84_v6   ;;  %638 = vmatprep.subr.bf16.mxu0 %v2360_v26  ;;  %3094 = vst [vmem:[#allocation9_spill] sm:$0xff] %v2455_v58  ;;  %3095 = vst [vmem:[#allocation10_spill] sm:$0xff] %v2458_v59 }
  0x24   :  { %681 = vmatprep.subr.bf16.mxu1 %v2364_v27  ;;  %110 = vperm.xlu1 %1846, %v79_v43  }
  0x26   :  { %639 = vmatpush1.bf16.msra.mxu0 %v2368_v28  ;;  %682 = vmatpush1.bf16.msra.mxu1 %v2370_v29 }
  0x27   :  { %145 = vperm.xlu0 %1845, %v86_v7   ;;  %640 = vmatprep.subr.bf16.mxu0 %v2374_v30  ;;  %v2469_v7 = vrot.slane %v92_v54, %v2462_v63 }
  0x28   :  { %683 = vmatprep.subr.bf16.mxu1 %v2376_v31  ;;  %120 = vperm.xlu1 %1846, %v81_v44   ;;  %v2476_v44 = vrot.slane %v92_v54, %v2466_v4 }
  0x2a   :  { %641 = vmatpush1.bf16.msra.mxu0 %v2380_v32  ;;  %684 = vmatpush1.bf16.msra.mxu1 %v2382_v33 }
  0x2b   :  { %155 = vperm.xlu0 %1845, %v88_v8   ;;  %642 = vmatprep.subr.bf16.mxu0 %v2386_v34 }
  0x2c   :  { %685 = vmatprep.subr.bf16.mxu1 %v2388_v35  ;;  %130 = vperm.xlu1 %1846, %v83_v45   ;;  %v2479_v45 = vrot.slane %v258_v55, %v2462_v63 }
  0x2e   :  { %643 = vmatpush1.bf16.msra.mxu0 %v2392_v36  ;;  %686 = vmatpush1.bf16.msra.mxu1 %v2394_v37 }
  0x2f   :  { %165 = vperm.xlu0 %1845, %v90_v9   ;;  %644 = vmatprep.subr.bf16.mxu0 %v2398_v38 }
  0x30   :  { %687 = vmatprep.subr.bf16.mxu1 %v2400_v39  ;;  %140 = vperm.xlu1 %1846, %v85_v46  }
  0x32   :  { %645 = vmatpush1.bf16.msra.mxu0 %v2404_v40  ;;  %688 = vmatpush1.bf16.msra.mxu1 %v2406_v41 }
  0x33   :  { %765 = vmatprep.subr.bf16.mxu0 %v2316_v10  ;;  %808 = vmatprep.subr.bf16.mxu1 %v2318_v11 }
  0x34   :  { %150 = vperm.xlu1 %1846, %v87_v47  }
  0x38   :  { %160 = vperm.xlu1 %1846, %v89_v48  }
  0x3c   :  { %170 = vperm.xlu1 %1846, %v91_v49   ;;  %v2483_v49 = vrot.slane %v258_v55, %v2466_v4 }
  0x8e   :  { %v96_v60 = vpop.permute.xlu0 %95 }
  0x8f   :  { %v194_v61 = vmul.f32 %v2449_v56, %v96_v60  ;;  %v195_v62 = vmul.f32 %v2452_v57, %v96_v60  ;;  %v196_v46 = vmul.f32 %v2469_v7, %v96_v60  ;;  %v197_v50 = vmul.f32 %v2476_v44, %v96_v60 }
  0x91   :  { %v280_v0 = vadd.f32 %v2455_v58, %v194_v61  ;;  %v281_v2 = vadd.f32 %v2458_v59, %v195_v62  ;;  %v282_v51 = vadd.f32 %v2479_v45, %v196_v46  ;;  %v283_v54 = vadd.f32 %v2483_v49, %v197_v50 }
  0x92   :  { %v101_v3 = vpop.permute.xlu0 %100 }
  0x93   :  { %v1752_v5 = vmul.f32 -1.442695, %v280_v0  ;;  %v1753_v6 = vmul.f32 -1.442695, %v281_v2  ;;  %v198_v8 = vmul.f32 %v2449_v56, %v101_v3  ;;  %v199_v9 = vmul.f32 %v2452_v57, %v101_v3 }
  0x94   :  { %v200_v61 = vmul.f32 %v2469_v7, %v101_v3  ;;  %v1754_v62 = vmul.f32 -1.442695, %v282_v51  ;;  %v201_v2 = vmul.f32 %v2476_v44, %v101_v3 }
  0x95   :  { %1895 = vpow2.f32 %v1752_v5  ;;  %v284_v42 = vadd.f32 %v2455_v58, %v198_v8  ;;  %v285_v43 = vadd.f32 %v2458_v59, %v199_v9 }
  0x96   :  { %1897 = vpow2.f32 %v1753_v6  ;;  %v286_v0 = vadd.f32 %v2479_v45, %v200_v61  ;;  %v287_v60 = vadd.f32 %v2483_v49, %v201_v2 }
  0x97   :  { %v1755_v47 = vmul.f32 -1.442695, %v284_v42  ;;  %v1756_v48 = vmul.f32 -1.442695, %v285_v43 }
  0x98   :  { %v1757_v9 = vmul.f32 -1.442695, %v286_v0 }
  0x99   :  { %1899 = vpow2.f32 %v1755_v47 }
  0x9a   :  { %1901 = vpow2.f32 %v1756_v48 }
  0x9b   :  { %1903 = vtanh.f32 %v283_v54 }
  0x9c   :  { %1905 = vpow2.f32 %v1754_v62 }
  0xa2   :  { %v1896_v5 = vpop.eup %1895 }
  0xa3   :  { %v1898_v6 = vpop.eup %1897  ;;  %v439_v8 = vadd.f32 1.0, %v1896_v5 }
  0xa4   :  { %v440_v55 = vadd.f32 1.0, %v1898_v6 }
  0xa5   :  { %1907 = vrcp.f32 %v439_v8 }
  0xa6   :  { %1909 = vrcp.f32 %v440_v55  ;;  %v1900_v42 = vpop.eup %1899 }
  0xa7   :  { %v1902_v43 = vpop.eup %1901  ;;  %1911 = vpow2.f32 %v1757_v9  ;;  %v442_v46 = vadd.f32 1.0, %v1900_v42 }
  0xa8   :  { %v443_v47 = vadd.f32 1.0, %v1902_v43  ;;  %1913 = vtanh.f32 %v287_v60  ;;  %v1904_v3 = vpop.eup %1903 }
  0xa9   :  { %1915 = vrcp.f32 %v442_v46  ;;  %v1906_v48 = vpop.eup %1905 }
  0xaa   :  { %1917 = vrcp.f32 %v443_v47  ;;  %v441_v5 = vadd.f32 1.0, %v1906_v48 }
  0xac   :  { %1919 = vrcp.f32 %v441_v5 }
  0xb2   :  { %v1908_v50 = vpop.eup %1907 }
  0xb3   :  { %v1910_v51 = vpop.eup %1909  ;;  %v461_v61 = vmul.f32 %v1908_v50, %v1904_v3 }
  0xb4   :  { %v459_v54 = vmul.f32 0.0, %v1910_v51  ;;  %v1912_v62 = vpop.eup %1911 }
  0xb5   :  { %v1914_v0 = vpop.eup %1913  ;;  %v444_v55 = vadd.f32 1.0, %v1912_v62 }
  0xb6   :  { %v1916_v6 = vpop.eup %1915  ;;  %v2492_v2 = vadd.f32 %v461_v61, %v459_v54  ;;  %v106_v61 = vpop.permute.xlu1 %105 }
  0xb7   :  { %v1918_v8 = vpop.eup %1917  ;;  %v462_v9 = vmul.f32 %v1916_v6, %v1914_v0  ;;  %v202_v54 = vmul.f32 %v2449_v56, %v106_v61  ;;  %v203_v62 = vmul.f32 %v2452_v57, %v106_v61  ;;  %v75_v0 = vld [vmem:[%s3063_s4] sm:$0xf] }
  0xb8   :  { %v460_v42 = vmul.f32 0.0, %v1918_v8  ;;  %1921 = vtanh.f32 %v2492_v2 }
  0xb9   :  { %1923 = vrcp.f32 %v444_v55  ;;  %v1920_v43 = vpop.eup %1919  ;;  %v288_v5 = vadd.f32 %v2455_v58, %v202_v54  ;;  %v2540_v55 = vrot.slane %v75_v0, %v2438_v52 }
  0xba   :  { %v2494_v60 = vadd.f32 %v462_v9, %v460_v42  ;;  %v111_v6 = vpop.permute.xlu1 %110  ;;  %v289_v9 = vadd.f32 %v2458_v59, %v203_v62 }
  0xbb   :  { %v206_v8 = vmul.f32 %v2449_v56, %v111_v6  ;;  %v207_v42 = vmul.f32 %v2452_v57, %v111_v6 }
  0xbc   :  { %1925 = vtanh.f32 %v2494_v60 }
  0xbd   :  { %v293_v52 = vadd.f32 %v2458_v59, %v207_v42  ;;  %v2558_v42 = vrot.slane %v75_v0, %v2462_v63  ;;  %v2565_v63 = vrot.slane %v75_v0, %v2466_v4 }
  0xc5   :  { %v1922_v46 = vpop.eup %1921 }
  0xc6   :  { %v1924_v47 = vpop.eup %1923  ;;  %v467_v48 = vmul.f32 %v1922_v46, %v1920_v43  ;;  %v365_v43 = vadd.f32 %v2540_v55, %v288_v5  ;;  %v2546_v46 = vrot.slane %v75_v0, %v2440_v53 }
  0xc9   :  { %v1926_v3 = vpop.eup %1925 }
  0xca   :  { %v468_v50 = vmul.f32 %v1926_v3, %v1924_v47  ;;  %v366_v47 = vadd.f32 %v2546_v46, %v289_v9  ;;  %v292_v3 = vadd.f32 %v2455_v58, %v206_v8  ;;  %v370_v8 = vadd.f32 %v2546_v46, %v293_v52 }
  0xcb   :  { %v205_v58 = vmul.f32 %v2476_v44, %v106_v61 }
  0xcc   :  { %v469_v51 = vpack.c.bf16 %v468_v50, %v467_v48  ;;  %v204_v48 = vmul.f32 %v2469_v7, %v106_v61  ;;  %v369_v57 = vadd.f32 %v2540_v55, %v292_v3  ;;  %v209_v61 = vmul.f32 %v2476_v44, %v111_v6 }
  0xce   :  { %663 = vmatmul.mubr.bf16.vlgmr.msra.gmra.mxu0 %v469_v51  ;;  %706 = vmatmul.mubr.bf16.vlgmr.msra.gmra.mxu1 %v469_v51  ;;  %v290_v5 = vadd.f32 %v2479_v45, %v204_v48 }
  0xcf   :  { %766 = vmatpush1.bf16.msra.mxu0 %v2320_v12  ;;  %809 = vmatpush1.bf16.msra.mxu1 %v2322_v13 }
  0xd0   :  { %767 = vmatprep.subr.bf16.mxu0 %v2328_v14  ;;  %810 = vmatprep.subr.bf16.mxu1 %v2330_v15  ;;  %v367_v48 = vadd.f32 %v2558_v42, %v290_v5 }
  0xd1   :  { %797 = vmatprep.mubr.bf16.mxu0 %v3067_v1  ;;  %840 = vmatprep.mubr.bf16.mxu1 %v3067_v1 }
  0xd3   :  { %768 = vmatpush1.bf16.msra.mxu0 %v2332_v16  ;;  %811 = vmatpush1.bf16.msra.mxu1 %v2334_v17 }
  0xd4   :  { %769 = vmatprep.subr.bf16.mxu0 %v2340_v18  ;;  %812 = vmatprep.subr.bf16.mxu1 %v2342_v19 }
  0xd7   :  { %770 = vmatpush1.bf16.msra.mxu0 %v2344_v20  ;;  %813 = vmatpush1.bf16.msra.mxu1 %v2346_v21 }
  0xd8   :  { %771 = vmatprep.subr.bf16.mxu0 %v2352_v22  ;;  %814 = vmatprep.subr.bf16.mxu1 %v2354_v23 }
  0xdb   :  { %772 = vmatpush1.bf16.msra.mxu0 %v2356_v24  ;;  %815 = vmatpush1.bf16.msra.mxu1 %v2358_v25 }
  0xdc   :  { %773 = vmatprep.subr.bf16.mxu0 %v2360_v26  ;;  %816 = vmatprep.subr.bf16.mxu1 %v2364_v27 }
  0xdf   :  { %774 = vmatpush1.bf16.msra.mxu0 %v2368_v28  ;;  %817 = vmatpush1.bf16.msra.mxu1 %v2370_v29 }
  0xe0   :  { %775 = vmatprep.subr.bf16.mxu0 %v2374_v30  ;;  %818 = vmatprep.subr.bf16.mxu1 %v2376_v31 }
  0xe3   :  { %776 = vmatpush1.bf16.msra.mxu0 %v2380_v32  ;;  %819 = vmatpush1.bf16.msra.mxu1 %v2382_v33 }
  0xe4   :  { %777 = vmatprep.subr.bf16.mxu0 %v2386_v34  ;;  %820 = vmatprep.subr.bf16.mxu1 %v2388_v35 }
  0xe7   :  { %778 = vmatpush1.bf16.msra.mxu0 %v2392_v36  ;;  %821 = vmatpush1.bf16.msra.mxu1 %v2394_v37 }
  0xe8   :  { %779 = vmatprep.subr.bf16.mxu0 %v2398_v38  ;;  %822 = vmatprep.subr.bf16.mxu1 %v2400_v39 }
  0xeb   :  { %780 = vmatpush1.bf16.msra.mxu0 %v2404_v40  ;;  %823 = vmatpush1.bf16.msra.mxu1 %v2406_v41 }
  0xec   :  { %900 = vmatprep.subr.bf16.mxu0 %v2316_v10  ;;  %943 = vmatprep.subr.bf16.mxu1 %v2318_v11 }
 0x18e   :  { %v664_v50 = vpop.f32.mrf.mxu0  ;;  %v707_v53 = vpop.f32.mrf.mxu1 }
 0x18f   :  { %v665_v51 = vadd.f32 %v664_v50, %v365_v43  ;;  %v208_v43 = vmul.f32 %v2469_v7, %v111_v6  ;;  %v708_v52 = vadd.f32 %v707_v53, %v367_v48 }
 0x190   :  { %v666_v54 = vpop.f32.mrf.mxu0 }
 0x191   :  { %v1790_v1 = vmul.f32 -1.442695, %v665_v51  ;;  %v667_v62 = vadd.f32 %v666_v54, %v366_v47  ;;  %v709_v51 = vpop.f32.mrf.mxu1  ;;  %v1792_v5 = vmul.f32 -1.442695, %v708_v52 }
 0x192   :  { %v668_v56 = vpop.f32.mrf.mxu0 }
 0x193   :  { %1927 = vpow2.f32 %v1790_v1  ;;  %v1791_v11 = vmul.f32 -1.442695, %v667_v62  ;;  %v669_v9 = vadd.f32 %v668_v56, %v369_v57  ;;  %v291_v56 = vadd.f32 %v2483_v49, %v205_v58  ;;  %v711_v54 = vpop.f32.mrf.mxu1 }
 0x194   :  { %v670_v50 = vpop.f32.mrf.mxu0  ;;  %v294_v57 = vadd.f32 %v2479_v45, %v208_v43 }
 0x195   :  { %1929 = vpow2.f32 %v1791_v11  ;;  %v1793_v47 = vmul.f32 -1.442695, %v669_v9  ;;  %v671_v3 = vadd.f32 %v670_v50, %v370_v8  ;;  %v368_v11 = vadd.f32 %v2565_v63, %v291_v56  ;;  %v713_v43 = vpop.f32.mrf.mxu1 }
 0x196   :  { %v371_v62 = vadd.f32 %v2558_v42, %v294_v57  ;;  %v295_v8 = vadd.f32 %v2483_v49, %v209_v61 }
 0x197   :  { %1931 = vpow2.f32 %v1793_v47  ;;  %v1794_v1 = vmul.f32 -1.442695, %v671_v3  ;;  %v710_v58 = vadd.f32 %v709_v51, %v368_v11 }
 0x198   :  { %v712_v9 = vadd.f32 %v711_v54, %v371_v62  ;;  %v372_v53 = vadd.f32 %v2565_v63, %v295_v8 }
 0x199   :  { %1933 = vpow2.f32 %v1794_v1 }
 0x19a   :  { %1935 = vpow2.f32 %v1792_v5  ;;  %v1795_v6 = vmul.f32 -1.442695, %v712_v9  ;;  %v714_v48 = vadd.f32 %v713_v43, %v372_v53 }
 0x1a0   :  { %v1928_v50 = vpop.eup %1927 }
 0x1a1   :  { %v734_v47 = vadd.f32 1.0, %v1928_v50 }
 0x1a2   :  { %v1930_v3 = vpop.eup %1929 }
 0x1a3   :  { %1937 = vrcp.f32 %v734_v47  ;;  %v735_v4 = vadd.f32 1.0, %v1930_v3 }
 0x1a4   :  { %v1932_v0 = vpop.eup %1931  ;;  %1939 = vtanh.f32 %v710_v58 }
 0x1a5   :  { %1941 = vrcp.f32 %v735_v4  ;;  %v737_v1 = vadd.f32 1.0, %v1932_v0 }
 0x1a6   :  { %v1934_v56 = vpop.eup %1933  ;;  %1943 = vpow2.f32 %v1795_v6 }
 0x1a7   :  { %1945 = vrcp.f32 %v737_v1  ;;  %v738_v57 = vadd.f32 1.0, %v1934_v56  ;;  %v1936_v51 = vpop.eup %1935 }
 0x1a8   :  { %1947 = vtanh.f32 %v714_v48  ;;  %v736_v8 = vadd.f32 1.0, %v1936_v51  ;;  %v3097_v51 = vld [vmem:[#allocation6_spill] sm:$0xff] }
 0x1a9   :  { %1949 = vrcp.f32 %v738_v57 }
 0x1aa   :  { %1951 = vrcp.f32 %v736_v8  ;;  %v3100_v8 = vld [vmem:[#allocation9_spill] sm:$0xff] }
 0x1b0   :  { %v1938_v61 = vpop.eup %1937 }
 0x1b1   :  { %v1940_v52 = vpop.eup %1939 }
 0x1b2   :  { %v1942_v54 = vpop.eup %1941  ;;  %v756_v5 = vmul.f32 %v1940_v52, %v1938_v61  ;;  %v116_v61 = vpop.permute.xlu0 %115  ;;  %v3098_v52 = vld [vmem:[#allocation7_spill] sm:$0xff] }
 0x1b3   :  { %v1944_v11 = vpop.eup %1943  ;;  %v754_v62 = vmul.f32 %v1942_v54, %v2492_v2  ;;  %v210_v54 = vmul.f32 %v3098_v52, %v116_v61 }
 0x1b4   :  { %v1946_v9 = vpop.eup %1945  ;;  %v739_v43 = vadd.f32 1.0, %v1944_v11  ;;  %v3099_v11 = vld [vmem:[#allocation8_spill] sm:$0xff] }
 0x1b5   :  { %v1948_v50 = vpop.eup %1947  ;;  %v2572_v58 = vadd.f32 %v756_v5, %v754_v62  ;;  %v211_v62 = vmul.f32 %v3099_v11, %v116_v61  ;;  %v121_v5 = vpop.permute.xlu1 %120 }
 0x1b6   :  { %v1950_v47 = vpop.eup %1949  ;;  %v757_v6 = vmul.f32 %v1948_v50, %v1946_v9  ;;  %v214_v9 = vmul.f32 %v3098_v52, %v121_v5  ;;  %v296_v50 = vadd.f32 %v3100_v8, %v210_v54 }
 0x1b7   :  { %v755_v3 = vmul.f32 %v1950_v47, %v2494_v60  ;;  %1953 = vtanh.f32 %v2572_v58  ;;  %v1952_v2 = vpop.eup %1951  ;;  %v3096_v60 = vmov 0   ;;  %v215_v47 = vmul.f32 %v3099_v11, %v121_v5 }
 0x1b8   :  { %1955 = vrcp.f32 %v739_v43  ;;  %v297_v43 = vadd.f32 %v2458_v59, %v211_v62 }
 0x1b9   :  { %v2576_v53 = vadd.f32 %v757_v6, %v755_v3  ;;  %v373_v3 = vadd.f32 %v2540_v55, %v296_v50  ;;  %v300_v6 = vadd.f32 %v3100_v8, %v214_v9 }
 0x1bb   :  { %1957 = vtanh.f32 %v2576_v53  ;;  %v377_v54 = vadd.f32 %v2540_v55, %v300_v6 }
 0x1c4   :  { %v1954_v4 = vpop.eup %1953 }
 0x1c5   :  { %v1956_v0 = vpop.eup %1955  ;;  %v762_v1 = vmul.f32 %v1954_v4, %v1952_v2 }
 0x1c8   :  { %v1958_v48 = vpop.eup %1957 }
 0x1c9   :  { %v763_v56 = vmul.f32 %v1958_v48, %v1956_v0  ;;  %v374_v0 = vadd.f32 %v2546_v46, %v297_v43  ;;  %v301_v48 = vadd.f32 %v2458_v59, %v215_v47 }
 0x1cb   :  { %v764_v57 = vpack.c.bf16 %v763_v56, %v762_v1  ;;  %v212_v1 = vmul.f32 %v2469_v7, %v116_v61  ;;  %v378_v9 = vadd.f32 %v2546_v46, %v301_v48 }
 0x1cd   :  { %798 = vmatmul.mubr.bf16.vlgmr.msra.gmra.mxu0 %v764_v57  ;;  %841 = vmatmul.mubr.bf16.vlgmr.msra.gmra.mxu1 %v764_v57  ;;  %v298_v43 = vadd.f32 %v2479_v45, %v212_v1 }
 0x1ce   :  { %901 = vmatpush1.bf16.msra.mxu0 %v2320_v12  ;;  %944 = vmatpush1.bf16.msra.mxu1 %v2322_v13 }
 0x1cf   :  { %902 = vmatprep.subr.bf16.mxu0 %v2328_v14  ;;  %945 = vmatprep.subr.bf16.mxu1 %v2330_v15 }
 0x1d0   :  { %932 = vmatprep.mubr.bf16.mxu0 %v3096_v60  ;;  %975 = vmatprep.mubr.bf16.mxu1 %v3096_v60 }
 0x1d2   :  { %903 = vmatpush1.bf16.msra.mxu0 %v2332_v16  ;;  %946 = vmatpush1.bf16.msra.mxu1 %v2334_v17 }
 0x1d3   :  { %904 = vmatprep.subr.bf16.mxu0 %v2340_v18  ;;  %947 = vmatprep.subr.bf16.mxu1 %v2342_v19 }
 0x1d6   :  { %905 = vmatpush1.bf16.msra.mxu0 %v2344_v20  ;;  %948 = vmatpush1.bf16.msra.mxu1 %v2346_v21 }
 0x1d7   :  { %906 = vmatprep.subr.bf16.mxu0 %v2352_v22  ;;  %949 = vmatprep.subr.bf16.mxu1 %v2354_v23 }
 0x1da   :  { %907 = vmatpush1.bf16.msra.mxu0 %v2356_v24  ;;  %950 = vmatpush1.bf16.msra.mxu1 %v2358_v25 }
 0x1db   :  { %908 = vmatprep.subr.bf16.mxu0 %v2360_v26  ;;  %951 = vmatprep.subr.bf16.mxu1 %v2364_v27 }
 0x1de   :  { %909 = vmatpush1.bf16.msra.mxu0 %v2368_v28  ;;  %952 = vmatpush1.bf16.msra.mxu1 %v2370_v29 }
 0x1df   :  { %910 = vmatprep.subr.bf16.mxu0 %v2374_v30  ;;  %953 = vmatprep.subr.bf16.mxu1 %v2376_v31 }
 0x1e2   :  { %911 = vmatpush1.bf16.msra.mxu0 %v2380_v32  ;;  %954 = vmatpush1.bf16.msra.mxu1 %v2382_v33 }
 0x1e3   :  { %912 = vmatprep.subr.bf16.mxu0 %v2386_v34  ;;  %955 = vmatprep.subr.bf16.mxu1 %v2388_v35 }
 0x1e6   :  { %913 = vmatpush1.bf16.msra.mxu0 %v2392_v36  ;;  %956 = vmatpush1.bf16.msra.mxu1 %v2394_v37 }
 0x1e7   :  { %914 = vmatprep.subr.bf16.mxu0 %v2398_v38  ;;  %957 = vmatprep.subr.bf16.mxu1 %v2400_v39 }
 0x1ea   :  { %915 = vmatpush1.bf16.msra.mxu0 %v2404_v40  ;;  %958 = vmatpush1.bf16.msra.mxu1 %v2406_v41 }
 0x1eb   :  { %1035 = vmatprep.subr.bf16.mxu0 %v2316_v10  ;;  %1078 = vmatprep.subr.bf16.mxu1 %v3097_v51 }
 0x28d   :  { %v799_v2 = vpop.f32.mrf.mxu0  ;;  %v842_v62 = vpop.f32.mrf.mxu1 }
 0x28e   :  { %v800_v4 = vadd.f32 %v799_v2, %v373_v3  ;;  %v216_v3 = vmul.f32 %v2469_v7, %v121_v5 }
 0x28f   :  { %v801_v56 = vpop.f32.mrf.mxu0 }
 0x290   :  { %v1796_v57 = vmul.f32 -1.442695, %v800_v4  ;;  %v802_v52 = vadd.f32 %v801_v56, %v374_v0  ;;  %v213_v4 = vmul.f32 %v2476_v44, %v116_v61  ;;  %v844_v0 = vpop.f32.mrf.mxu1  ;;  %v375_v56 = vadd.f32 %v2558_v42, %v298_v43 }
 0x291   :  { %v803_v11 = vpop.f32.mrf.mxu0 }
 0x292   :  { %1959 = vpow2.f32 %v1796_v57  ;;  %v1797_v51 = vmul.f32 -1.442695, %v802_v52  ;;  %v804_v50 = vadd.f32 %v803_v11, %v377_v54  ;;  %v302_v52 = vadd.f32 %v2479_v45, %v216_v3  ;;  %v846_v1 = vpop.f32.mrf.mxu1 }
 0x293   :  { %v805_v2 = vpop.f32.mrf.mxu0  ;;  %v217_v11 = vmul.f32 %v2476_v44, %v121_v5  ;;  %v843_v48 = vadd.f32 %v842_v62, %v375_v56  ;;  %v299_v57 = vadd.f32 %v2483_v49, %v213_v4 }
 0x294   :  { %1961 = vpow2.f32 %v1797_v51  ;;  %v1799_v47 = vmul.f32 -1.442695, %v804_v50  ;;  %v806_v59 = vadd.f32 %v805_v2, %v378_v9  ;;  %v379_v51 = vadd.f32 %v2558_v42, %v302_v52 }
 0x295   :  { %v1798_v54 = vmul.f32 -1.442695, %v843_v48  ;;  %v376_v50 = vadd.f32 %v2565_v63, %v299_v57  ;;  %v303_v9 = vadd.f32 %v2483_v49, %v217_v11 }
 0x296   :  { %1963 = vpow2.f32 %v1799_v47  ;;  %v1800_v6 = vmul.f32 -1.442695, %v806_v59  ;;  %v847_v61 = vadd.f32 %v846_v1, %v379_v51  ;;  %v848_v47 = vpop.f32.mrf.mxu1 }
 0x297   :  { %v845_v2 = vadd.f32 %v844_v0, %v376_v50  ;;  %v380_v5 = vadd.f32 %v2565_v63, %v303_v9 }
 0x298   :  { %1965 = vpow2.f32 %v1800_v6  ;;  %v1801_v6 = vmul.f32 -1.442695, %v847_v61 }
 0x299   :  { %1967 = vpow2.f32 %v1798_v54  ;;  %v849_v56 = vadd.f32 %v848_v47, %v380_v5 }
 0x29f   :  { %v1960_v59 = vpop.eup %1959 }
 0x2a0   :  { %v869_v43 = vadd.f32 1.0, %v1960_v59 }
 0x2a1   :  { %v1962_v3 = vpop.eup %1961 }
 0x2a2   :  { %1969 = vrcp.f32 %v869_v43  ;;  %v870_v62 = vadd.f32 1.0, %v1962_v3 }
 0x2a3   :  { %v1964_v4 = vpop.eup %1963  ;;  %1971 = vtanh.f32 %v845_v2 }
 0x2a4   :  { %1973 = vrcp.f32 %v870_v62  ;;  %v872_v52 = vadd.f32 1.0, %v1964_v4 }
 0x2a5   :  { %v1966_v48 = vpop.eup %1965  ;;  %1975 = vpow2.f32 %v1801_v6 }
 0x2a6   :  { %1977 = vrcp.f32 %v872_v52  ;;  %v873_v11 = vadd.f32 1.0, %v1966_v48  ;;  %v1968_v0 = vpop.eup %1967 }
 0x2a7   :  { %1979 = vtanh.f32 %v849_v56  ;;  %v871_v59 = vadd.f32 1.0, %v1968_v0 }
 0x2a8   :  { %1981 = vrcp.f32 %v873_v11 }
 0x2a9   :  { %1983 = vrcp.f32 %v871_v59 }
 0x2af   :  { %v1970_v57 = vpop.eup %1969 }
 0x2b0   :  { %v1972_v1 = vpop.eup %1971 }
 0x2b1   :  { %v1974_v51 = vpop.eup %1973  ;;  %v891_v61 = vmul.f32 %v1972_v1, %v1970_v57 }
 0x2b2   :  { %v1976_v54 = vpop.eup %1975  ;;  %v889_v50 = vmul.f32 %v1974_v51, %v2572_v58 }
 0x2b3   :  { %v1978_v9 = vpop.eup %1977  ;;  %v874_v3 = vadd.f32 1.0, %v1976_v54 }
 0x2b4   :  { %v1980_v2 = vpop.eup %1979  ;;  %v2638_v43 = vadd.f32 %v891_v61, %v889_v50 }
 0x2b5   :  { %v1982_v47 = vpop.eup %1981  ;;  %v892_v5 = vmul.f32 %v1980_v2, %v1978_v9 }
 0x2b6   :  { %v890_v6 = vmul.f32 %v1982_v47, %v2576_v53  ;;  %1985 = vtanh.f32 %v2638_v43  ;;  %v1984_v58 = vpop.eup %1983 }
 0x2b7   :  { %1987 = vrcp.f32 %v874_v3 }
 0x2b8   :  { %v2642_v62 = vadd.f32 %v892_v5, %v890_v6 }
 0x2ba   :  { %1989 = vtanh.f32 %v2642_v62 }
 0x2c3   :  { %v1986_v4 = vpop.eup %1985 }
 0x2c4   :  { %v1988_v56 = vpop.eup %1987  ;;  %v897_v48 = vmul.f32 %v1986_v4, %v1984_v58 }
 0x2c7   :  { %v1990_v52 = vpop.eup %1989 }
 0x2c8   :  { %v898_v11 = vmul.f32 %v1990_v52, %v1988_v56 }
 0x2ca   :  { %v899_v0 = vpack.c.bf16 %v898_v11, %v897_v48 }
 0x2cc   :  { %933 = vmatmul.mubr.bf16.vlgmr.msra.gmra.mxu0 %v899_v0  ;;  %976 = vmatmul.mubr.bf16.vlgmr.msra.gmra.mxu1 %v899_v0 }
 0x2cd   :  { %1036 = vmatpush1.bf16.msra.mxu0 %v2320_v12  ;;  %1079 = vmatpush1.bf16.msra.mxu1 %v2322_v13  ;;  %v3101_v12 = vld [vmem:[#allocation6_spill] sm:$0xff]  ;;  %v126_v13 = vpop.permute.xlu0 %125 }
 0x2ce   :  { %1037 = vmatprep.subr.bf16.mxu0 %v2328_v14  ;;  %1080 = vmatprep.subr.bf16.mxu1 %v2330_v15  ;;  %v3102_v14 = vld [vmem:[#allocation7_spill] sm:$0xff]  ;;  %v221_v1 = vmul.f32 %v2476_v44, %v126_v13 }
 0x2cf   :  { %1067 = vmatprep.mubr.bf16.mxu0 %v3096_v60  ;;  %1110 = vmatprep.mubr.bf16.mxu1 %v3096_v60  ;;  %v218_v15 = vmul.f32 %v3102_v14, %v126_v13 }
 0x2d0   :  { %v307_v2 = vadd.f32 %v2483_v49, %v221_v1  ;;  %v2711_v1 = vld [vmem:[#allocation3 + $0xe0] ss:$16 sps:$4 sm:$0xff]  }
 0x2d1   :  { %1038 = vmatpush1.bf16.msra.mxu0 %v2332_v16  ;;  %1081 = vmatpush1.bf16.msra.mxu1 %v2334_v17  ;;  %v3103_v16 = vld [vmem:[#allocation8_spill] sm:$0xff] }
 0x2d2   :  { %1039 = vmatprep.subr.bf16.mxu0 %v2340_v18  ;;  %1082 = vmatprep.subr.bf16.mxu1 %v2342_v19  ;;  %v219_v17 = vmul.f32 %v3103_v16, %v126_v13  ;;  %v131_v18 = vpop.permute.xlu1 %130  ;;  %v384_v5 = vadd.f32 %v2565_v63, %v307_v2  ;;  %v2737_v2 = vld [vmem:[#allocation3 + $0xa0] ss:$16 sps:$4 sm:$0xff]  }
 0x2d3   :  { %v222_v19 = vmul.f32 %v3102_v14, %v131_v18  ;;  %v225_v9 = vmul.f32 %v2476_v44, %v131_v18 }
 0x2d5   :  { %1040 = vmatpush1.bf16.msra.mxu0 %v2344_v20  ;;  %1083 = vmatpush1.bf16.msra.mxu1 %v2346_v21  ;;  %v304_v20 = vadd.f32 %v3100_v8, %v218_v15  ;;  %v223_v21 = vmul.f32 %v3103_v16, %v131_v18  ;;  %v311_v4 = vadd.f32 %v2483_v49, %v225_v9  ;;  %v2731_v9 = vld [vmem:[#allocation3 + $0xa4] ss:$16 sps:$4 sm:$0xff]  }
 0x2d6   :  { %1041 = vmatprep.subr.bf16.mxu0 %v2352_v22  ;;  %1084 = vmatprep.subr.bf16.mxu1 %v2354_v23  ;;  %v3104_v22 = vld [vmem:[#allocation10_spill] sm:$0xff] }
 0x2d7   :  { %v305_v23 = vadd.f32 %v3104_v22, %v219_v17 }
 0x2d9   :  { %1042 = vmatpush1.bf16.msra.mxu0 %v2356_v24  ;;  %1085 = vmatpush1.bf16.msra.mxu1 %v2358_v25  ;;  %v381_v24 = vadd.f32 %v2540_v55, %v304_v20 }
 0x2da   :  { %1043 = vmatprep.subr.bf16.mxu0 %v2360_v26  ;;  %1086 = vmatprep.subr.bf16.mxu1 %v2364_v27  ;;  %v382_v27 = vadd.f32 %v2546_v46, %v305_v23 }
 0x2dd   :  { %1044 = vmatpush1.bf16.msra.mxu0 %v2368_v28  ;;  %1087 = vmatpush1.bf16.msra.mxu1 %v2370_v29  ;;  %v309_v28 = vadd.f32 %v3104_v22, %v223_v21  ;;  %v220_v29 = vmul.f32 %v2469_v7, %v126_v13  ;;  %v388_v13 = vadd.f32 %v2565_v63, %v311_v4  ;;  %v2755_v4 = vld [vmem:[#allocation3 + $0x64] ss:$16 sps:$4 sm:$0xff]  }
 0x2de   :  { %1045 = vmatprep.subr.bf16.mxu0 %v2374_v30  ;;  %1088 = vmatprep.subr.bf16.mxu1 %v2376_v31 }
 0x2e1   :  { %1046 = vmatpush1.bf16.msra.mxu0 %v2380_v32  ;;  %1089 = vmatpush1.bf16.msra.mxu1 %v2382_v33 }
 0x2e2   :  { %1047 = vmatprep.subr.bf16.mxu0 %v2386_v34  ;;  %1090 = vmatprep.subr.bf16.mxu1 %v2388_v35 }
 0x2e5   :  { %1048 = vmatpush1.bf16.msra.mxu0 %v2392_v36  ;;  %1091 = vmatpush1.bf16.msra.mxu1 %v2394_v37 }
 0x2e6   :  { %1049 = vmatprep.subr.bf16.mxu0 %v2398_v38  ;;  %1092 = vmatprep.subr.bf16.mxu1 %v2400_v39  ;;  %v386_v38 = vadd.f32 %v2546_v46, %v309_v28  ;;  %v224_v39 = vmul.f32 %v2469_v7, %v131_v18 }
 0x2e8   :  { %v310_v61 = vadd.f32 %v2479_v45, %v224_v39 }
 0x2e9   :  { %1050 = vmatpush1.bf16.msra.mxu0 %v2404_v40  ;;  %1093 = vmatpush1.bf16.msra.mxu1 %v2406_v41  ;;  %v306_v40 = vadd.f32 %v2479_v45, %v220_v29 }
 0x2ea   :  { %1170 = vmatprep.subr.bf16.mxu0 %v2316_v10  ;;  %1213 = vmatprep.subr.bf16.mxu1 %v3101_v12  ;;  %v308_v10 = vadd.f32 %v3100_v8, %v222_v19  ;;  %v387_v3 = vadd.f32 %v2558_v42, %v310_v61  ;;  %v2728_v61 = vld [vmem:[#allocation3 + $0xc8] ss:$16 sps:$4 sm:$0xff]  }
 0x2eb   :  { %v383_v50 = vadd.f32 %v2558_v42, %v306_v40 }
 0x2ec   :  { %v385_v33 = vadd.f32 %v2540_v55, %v308_v10 }
 0x38c   :  { %v934_v25 = vpop.f32.mrf.mxu0  ;;  %v977_v35 = vpop.f32.mrf.mxu1 }
 0x38d   :  { %v935_v26 = vadd.f32 %v934_v25, %v381_v24  ;;  %v978_v59 = vadd.f32 %v977_v35, %v383_v50  ;;  %v2725_v50 = vld [vmem:[#allocation3 + $0xc0] ss:$16 sps:$4 sm:$0xff]  }
 0x38e   :  { %v936_v30 = vpop.f32.mrf.mxu0  ;;  %v979_v51 = vpop.f32.mrf.mxu1 }
 0x38f   :  { %v1802_v31 = vmul.f32 -1.442695, %v935_v26  ;;  %v937_v32 = vadd.f32 %v936_v30, %v382_v27  ;;  %v1804_v6 = vmul.f32 -1.442695, %v978_v59  ;;  %v980_v52 = vadd.f32 %v979_v51, %v384_v5  ;;  %v2717_v51 = vld [vmem:[#allocation3 + $0xc4] ss:$16 sps:$4 sm:$0xff]  }
 0x390   :  { %v938_v34 = vpop.f32.mrf.mxu0  ;;  %v981_v47 = vpop.f32.mrf.mxu1  ;;  %v2734_v59 = vld [vmem:[#allocation3 + $0xac] ss:$16 sps:$4 sm:$0xff]   ;;  %v2749_v5 = vld [vmem:[#allocation3 + $0x80] ss:$16 sps:$4 sm:$0xff]  }
 0x391   :  { %1991 = vpow2.f32 %v1802_v31  ;;  %v1803_v36 = vmul.f32 -1.442695, %v937_v32  ;;  %v939_v37 = vadd.f32 %v938_v34, %v385_v33  ;;  %v982_v58 = vadd.f32 %v981_v47, %v387_v3  ;;  %v2740_v47 = vld [vmem:[#allocation3 + $0xa8] ss:$16 sps:$4 sm:$0xff]   ;;  %v2743_v3 = vld [vmem:[#allocation3 + $0x84] ss:$16 sps:$4 sm:$0xff]  }
 0x392   :  { %v940_v41 = vpop.f32.mrf.mxu0  ;;  %v983_v11 = vpop.f32.mrf.mxu1 }
 0x393   :  { %1993 = vpow2.f32 %v1803_v36  ;;  %v1805_v53 = vmul.f32 -1.442695, %v939_v37  ;;  %v941_v57 = vadd.f32 %v940_v41, %v386_v38  ;;  %v1807_v12 = vmul.f32 -1.442695, %v982_v58  ;;  %v2752_v58 = vld [vmem:[#allocation3 + $0x88] ss:$16 sps:$4 sm:$0xff]  }
 0x394   :  { %v984_v18 = vadd.f32 %v983_v11, %v388_v13  ;;  %v2767_v11 = vld [vmem:[#allocation3 + $0x44] ss:$16 sps:$4 sm:$0xff]   ;;  %v2776_v13 = vld [vmem:[#allocation3 + $0x48] ss:$16 sps:$4 sm:$0xff]  }
 0x395   :  { %1995 = vpow2.f32 %v1805_v53  ;;  %v1806_v54 = vmul.f32 -1.442695, %v941_v57 }
 0x397   :  { %1997 = vpow2.f32 %v1806_v54  ;;  %v2720_v54 = vld [vmem:[#allocation3 + $0xcc] ss:$16 sps:$4 sm:$0xff]  }
 0x398   :  { %1999 = vpow2.f32 %v1804_v6  ;;  %v2746_v6 = vld [vmem:[#allocation3 + $0x8c] ss:$16 sps:$4 sm:$0xff]  }
 0x39e   :  { %v1992_v56 = vpop.eup %1991 }
 0x39f   :  { %v1004_v48 = vadd.f32 1.0, %v1992_v56  ;;  %v2758_v56 = vld [vmem:[#allocation3 + $0x6c] ss:$16 sps:$4 sm:$0xff]  }
 0x3a0   :  { %v1994_v0 = vpop.eup %1993 }
 0x3a1   :  { %2001 = vrcp.f32 %v1004_v48  ;;  %v1005_v15 = vadd.f32 1.0, %v1994_v0  ;;  %v2764_v48 = vld [vmem:[#allocation3 + $0x68] ss:$16 sps:$4 sm:$0xff]   ;;  %v2770_v0 = vld [vmem:[#allocation3 + $0x4c] ss:$16 sps:$4 sm:$0xff]  }
 0x3a2   :  { %v1996_v17 = vpop.eup %1995  ;;  %2003 = vtanh.f32 %v980_v52  ;;  %v2761_v52 = vld [vmem:[#allocation3 + $0x60] ss:$16 sps:$4 sm:$0xff]  }
 0x3a3   :  { %2005 = vrcp.f32 %v1005_v15  ;;  %v1007_v19 = vadd.f32 1.0, %v1996_v17  ;;  %v2779_v15 = vld [vmem:[#allocation3 + $0x24] ss:$16 sps:$4 sm:$0xff]   ;;  %v2782_v17 = vld [vmem:[#allocation3 + $0x2c] ss:$16 sps:$4 sm:$0xff]  }
 0x3a4   :  { %v1998_v20 = vpop.eup %1997  ;;  %2007 = vpow2.f32 %v1807_v12  ;;  %v2773_v12 = vld [vmem:[#allocation3 + $0x40] ss:$16 sps:$4 sm:$0xff]  }
 0x3a5   :  { %2009 = vrcp.f32 %v1007_v19  ;;  %v1008_v21 = vadd.f32 1.0, %v1998_v20  ;;  %v2000_v23 = vpop.eup %1999  ;;  %v2788_v19 = vld [vmem:[#allocation3 + $0x28] ss:$16 sps:$4 sm:$0xff]   ;;  %v2791_v20 = vld [vmem:[#allocation3 + $0x4] ss:$16 sps:$4 sm:$0xff]  }
 0x3a6   :  { %2011 = vtanh.f32 %v984_v18  ;;  %v1006_v30 = vadd.f32 1.0, %v2000_v23  ;;  %v2785_v18 = vld [vmem:[#allocation3 + $0x20] ss:$16 sps:$4 sm:$0xff]  }
 0x3a7   :  { %2013 = vrcp.f32 %v1008_v21  ;;  %v2794_v21 = vld [vmem:[#allocation3 + $0xc] ss:$16 sps:$4 sm:$0xff]   ;;  %v2797_v23 = vld [vmem:[#allocation3] ss:$16 sps:$4 sm:$0xff]  }
 0x3a8   :  { %2015 = vrcp.f32 %v1006_v30 }
 0x3ae   :  { %v2002_v24 = vpop.eup %2001 }
 0x3af   :  { %v2004_v10 = vpop.eup %2003 }
 0x3b0   :  { %v2006_v25 = vpop.eup %2005  ;;  %v1026_v28 = vmul.f32 %v2004_v10, %v2002_v24  ;;  %v2800_v24 = vld [vmem:[#allocation3 + $0x8] ss:$16 sps:$4 sm:$0xff]   ;;  %v2803_v10 = vld [vmem:[#allocation3 + $0xe4] ss:$16 sps:$4 sm:$0xff]  }
 0x3b1   :  { %v2008_v26 = vpop.eup %2007  ;;  %v1024_v27 = vmul.f32 %v2006_v25, %v2638_v43  ;;  %v2806_v25 = vld [vmem:[#allocation3 + $0xec] ss:$16 sps:$4 sm:$0xff]  }
 0x3b2   :  { %v2010_v29 = vpop.eup %2009  ;;  %v1009_v34 = vadd.f32 1.0, %v2008_v26  ;;  %3105 = vst [vmem:[#allocation9_spill] sm:$0xff] %v2806_v25  ;;  %v136_v26 = vpop.permute.xlu0 %135 }
 0x3b3   :  { %v2012_v31 = vpop.eup %2011  ;;  %v2704_v32 = vadd.f32 %v1026_v28, %v1024_v27  ;;  %v226_v27 = vmul.f32 %v3102_v14, %v136_v26  ;;  %v227_v28 = vmul.f32 %v3103_v16, %v136_v26 }
 0x3b4   :  { %v2014_v33 = vpop.eup %2013  ;;  %v1027_v36 = vmul.f32 %v2012_v31, %v2010_v29  ;;  %v141_v29 = vpop.permute.xlu1 %140 }
 0x3b5   :  { %v1025_v35 = vmul.f32 %v2014_v33, %v2642_v62  ;;  %2017 = vtanh.f32 %v2704_v32  ;;  %v2016_v43 = vpop.eup %2015  ;;  %v2714_v62 = vld [vmem:[#allocation3 + $0xe8] ss:$16 sps:$4 sm:$0xff]   ;;  %v230_v30 = vmul.f32 %v3102_v14, %v141_v29  ;;  %v312_v31 = vadd.f32 %v3100_v8, %v226_v27 }
 0x3b6   :  { %2019 = vrcp.f32 %v1009_v34  ;;  %v231_v33 = vmul.f32 %v3103_v16, %v141_v29  ;;  %v313_v34 = vadd.f32 %v3104_v22, %v227_v28 }
 0x3b7   :  { %v2708_v37 = vadd.f32 %v1027_v36, %v1025_v35  ;;  %v389_v35 = vadd.f32 %v2540_v55, %v312_v31  ;;  %v316_v36 = vadd.f32 %v3100_v8, %v230_v30 }
 0x3b9   :  { %2021 = vtanh.f32 %v2708_v37  ;;  %v393_v27 = vadd.f32 %v2540_v55, %v316_v36 }
 0x3c2   :  { %v2018_v38 = vpop.eup %2017 }
 0x3c3   :  { %v2020_v39 = vpop.eup %2019  ;;  %v1032_v41 = vmul.f32 %v2018_v38, %v2016_v43 }
 0x3c6   :  { %v2022_v40 = vpop.eup %2021 }
 0x3c7   :  { %v1033_v53 = vmul.f32 %v2022_v40, %v2020_v39  ;;  %v390_v39 = vadd.f32 %v2546_v46, %v313_v34  ;;  %v317_v40 = vadd.f32 %v3104_v22, %v231_v33 }
 0x3c9   :  { %v1034_v57 = vpack.c.bf16 %v1033_v53, %v1032_v41  ;;  %v228_v41 = vmul.f32 %v2469_v7, %v136_v26  ;;  %v394_v30 = vadd.f32 %v2546_v46, %v317_v40 }
 0x3cb   :  { %1068 = vmatmul.mubr.bf16.vlgmr.msra.gmra.mxu0 %v1034_v57  ;;  %1111 = vmatmul.mubr.bf16.vlgmr.msra.gmra.mxu1 %v1034_v57  ;;  %v314_v34 = vadd.f32 %v2479_v45, %v228_v41 }
 0x3cc   :  { %1171 = vmatpush1.bf16.msra.mxu0 %v2711_v1  ;;  %1214 = vmatpush1.bf16.msra.mxu1 %v2714_v62 }
 0x3cd   :  { %1172 = vmatprep.subr.bf16.mxu0 %v2717_v51  ;;  %1215 = vmatprep.subr.bf16.mxu1 %v2720_v54 }
 0x3ce   :  { %1202 = vmatprep.mubr.bf16.mxu0 %v3096_v60  ;;  %1245 = vmatprep.mubr.bf16.mxu1 %v3096_v60 }
 0x3d0   :  { %1173 = vmatpush1.bf16.msra.mxu0 %v2725_v50  ;;  %1216 = vmatpush1.bf16.msra.mxu1 %v2728_v61 }
 0x3d1   :  { %1174 = vmatprep.subr.bf16.mxu0 %v2731_v9  ;;  %1217 = vmatprep.subr.bf16.mxu1 %v2734_v59 }
 0x3d4   :  { %1175 = vmatpush1.bf16.msra.mxu0 %v2737_v2  ;;  %1218 = vmatpush1.bf16.msra.mxu1 %v2740_v47 }
 0x3d5   :  { %1176 = vmatprep.subr.bf16.mxu0 %v2743_v3  ;;  %1219 = vmatprep.subr.bf16.mxu1 %v2746_v6 }
 0x3d8   :  { %1177 = vmatpush1.bf16.msra.mxu0 %v2749_v5  ;;  %1220 = vmatpush1.bf16.msra.mxu1 %v2752_v58 }
 0x3d9   :  { %1178 = vmatprep.subr.bf16.mxu0 %v2755_v4  ;;  %1221 = vmatprep.subr.bf16.mxu1 %v2758_v56 }
 0x3dc   :  { %1179 = vmatpush1.bf16.msra.mxu0 %v2761_v52  ;;  %1222 = vmatpush1.bf16.msra.mxu1 %v2764_v48 }
 0x3dd   :  { %1180 = vmatprep.subr.bf16.mxu0 %v2767_v11  ;;  %1223 = vmatprep.subr.bf16.mxu1 %v2770_v0 }
 0x3e0   :  { %1181 = vmatpush1.bf16.msra.mxu0 %v2773_v12  ;;  %1224 = vmatpush1.bf16.msra.mxu1 %v2776_v13 }
 0x3e1   :  { %1182 = vmatprep.subr.bf16.mxu0 %v2779_v15  ;;  %1225 = vmatprep.subr.bf16.mxu1 %v2782_v17 }
 0x3e4   :  { %1183 = vmatpush1.bf16.msra.mxu0 %v2785_v18  ;;  %1226 = vmatpush1.bf16.msra.mxu1 %v2788_v19 }
 0x3e5   :  { %1184 = vmatprep.subr.bf16.mxu0 %v2791_v20  ;;  %1227 = vmatprep.subr.bf16.mxu1 %v2794_v21 }
 0x3e8   :  { %1185 = vmatpush1.bf16.msra.mxu0 %v2797_v23  ;;  %1228 = vmatpush1.bf16.msra.mxu1 %v2800_v24 }
 0x3e9   :  { %1305 = vmatprep.subr.bf16.mxu0 %v2803_v10  ;;  %1348 = vmatprep.subr.bf16.mxu1 %v2806_v25 }
 0x48b   :  { %v1069_v43 = vpop.f32.mrf.mxu0  ;;  %v1112_v28 = vpop.f32.mrf.mxu1 }
 0x48c   :  { %v1070_v38 = vadd.f32 %v1069_v43, %v389_v35  ;;  %v232_v35 = vmul.f32 %v2469_v7, %v141_v29 }
 0x48d   :  { %v1071_v53 = vpop.f32.mrf.mxu0 }
 0x48e   :  { %v1808_v57 = vmul.f32 -1.442695, %v1070_v38  ;;  %v1072_v14 = vadd.f32 %v1071_v53, %v390_v39  ;;  %v229_v38 = vmul.f32 %v2476_v44, %v136_v26  ;;  %v1114_v39 = vpop.f32.mrf.mxu1  ;;  %v391_v53 = vadd.f32 %v2558_v42, %v314_v34 }
 0x48f   :  { %v1073_v16 = vpop.f32.mrf.mxu0 }
 0x490   :  { %2023 = vpow2.f32 %v1808_v57  ;;  %v1809_v25 = vmul.f32 -1.442695, %v1072_v14  ;;  %v1074_v31 = vadd.f32 %v1073_v16, %v393_v27  ;;  %v318_v14 = vadd.f32 %v2479_v45, %v232_v35  ;;  %v1116_v41 = vpop.f32.mrf.mxu1 }
 0x491   :  { %v1075_v43 = vpop.f32.mrf.mxu0  ;;  %v233_v16 = vmul.f32 %v2476_v44, %v141_v29  ;;  %v1113_v40 = vadd.f32 %v1112_v28, %v391_v53  ;;  %v315_v57 = vadd.f32 %v2483_v49, %v229_v38 }
 0x492   :  { %2025 = vpow2.f32 %v1809_v25  ;;  %v1811_v33 = vmul.f32 -1.442695, %v1074_v31  ;;  %v1076_v22 = vadd.f32 %v1075_v43, %v394_v30  ;;  %v395_v25 = vadd.f32 %v2558_v42, %v318_v14 }
 0x493   :  { %v1810_v27 = vmul.f32 -1.442695, %v1113_v40  ;;  %v392_v31 = vadd.f32 %v2565_v63, %v315_v57  ;;  %v319_v30 = vadd.f32 %v2483_v49, %v233_v16 }
 0x494   :  { %2027 = vpow2.f32 %v1811_v33  ;;  %v1812_v36 = vmul.f32 -1.442695, %v1076_v22  ;;  %v1117_v26 = vadd.f32 %v1116_v41, %v395_v25  ;;  %v1118_v33 = vpop.f32.mrf.mxu1 }
 0x495   :  { %v1115_v43 = vadd.f32 %v1114_v39, %v392_v31  ;;  %v396_v29 = vadd.f32 %v2565_v63, %v319_v30 }
 0x496   :  { %2029 = vpow2.f32 %v1812_v36  ;;  %v1813_v36 = vmul.f32 -1.442695, %v1117_v26 }
 0x497   :  { %2031 = vpow2.f32 %v1810_v27  ;;  %v1119_v53 = vadd.f32 %v1118_v33, %v396_v29 }
 0x49d   :  { %v2024_v22 = vpop.eup %2023 }
 0x49e   :  { %v1139_v34 = vadd.f32 1.0, %v2024_v22 }
 0x49f   :  { %v2026_v35 = vpop.eup %2025 }
 0x4a0   :  { %2033 = vrcp.f32 %v1139_v34  ;;  %v1140_v28 = vadd.f32 1.0, %v2026_v35 }
 0x4a1   :  { %v2028_v38 = vpop.eup %2027  ;;  %2035 = vtanh.f32 %v1115_v43 }
 0x4a2   :  { %2037 = vrcp.f32 %v1140_v28  ;;  %v1142_v14 = vadd.f32 1.0, %v2028_v38 }
 0x4a3   :  { %v2030_v40 = vpop.eup %2029  ;;  %2039 = vpow2.f32 %v1813_v36 }
 0x4a4   :  { %2041 = vrcp.f32 %v1142_v14  ;;  %v1143_v16 = vadd.f32 1.0, %v2030_v40  ;;  %v2032_v39 = vpop.eup %2031 }
 0x4a5   :  { %2043 = vtanh.f32 %v1119_v53  ;;  %v1141_v22 = vadd.f32 1.0, %v2032_v39 }
 0x4a6   :  { %2045 = vrcp.f32 %v1143_v16 }
 0x4a7   :  { %2047 = vrcp.f32 %v1141_v22 }
 0x4ad   :  { %v2034_v57 = vpop.eup %2033 }
 0x4ae   :  { %v2036_v41 = vpop.eup %2035 }
 0x4af   :  { %v2038_v25 = vpop.eup %2037  ;;  %v1161_v26 = vmul.f32 %v2036_v41, %v2034_v57  ;;  %v146_v57 = vpop.permute.xlu0 %145  ;;  %v3107_v41 = vld [vmem:[#allocation7_spill] sm:$0xff] }
 0x4b0   :  { %v2040_v27 = vpop.eup %2039  ;;  %v1159_v31 = vmul.f32 %v2038_v25, %v2704_v32  ;;  %v234_v25 = vmul.f32 %v3107_v41, %v146_v57 }
 0x4b1   :  { %v2042_v30 = vpop.eup %2041  ;;  %v1144_v35 = vadd.f32 1.0, %v2040_v27  ;;  %v3108_v27 = vld [vmem:[#allocation8_spill] sm:$0xff] }
 0x4b2   :  { %v2044_v43 = vpop.eup %2043  ;;  %v2834_v34 = vadd.f32 %v1161_v26, %v1159_v31  ;;  %v235_v31 = vmul.f32 %v3108_v27, %v146_v57  ;;  %v151_v26 = vpop.permute.xlu1 %150  ;;  %v320_v22 = vadd.f32 %v3100_v8, %v234_v25 }
 0x4b3   :  { %v2046_v33 = vpop.eup %2045  ;;  %v1162_v29 = vmul.f32 %v2044_v43, %v2042_v30  ;;  %v238_v30 = vmul.f32 %v3107_v41, %v151_v26  ;;  %v239_v43 = vmul.f32 %v3108_v27, %v151_v26 }
 0x4b4   :  { %v1160_v36 = vmul.f32 %v2046_v33, %v2708_v37  ;;  %2049 = vtanh.f32 %v2834_v34  ;;  %v2048_v32 = vpop.eup %2047  ;;  %v3106_v37 = vld [vmem:[#allocation9_spill] sm:$0xff]  ;;  %v3109_v33 = vld [vmem:[#allocation10_spill] sm:$0xff] }
 0x4b5   :  { %2051 = vrcp.f32 %v1144_v35  ;;  %v321_v35 = vadd.f32 %v3109_v33, %v235_v31 }
 0x4b6   :  { %v2838_v28 = vadd.f32 %v1162_v29, %v1160_v36  ;;  %v397_v36 = vadd.f32 %v2540_v55, %v320_v22  ;;  %v324_v29 = vadd.f32 %v3100_v8, %v238_v30 }
 0x4b8   :  { %2053 = vtanh.f32 %v2838_v28  ;;  %v401_v25 = vadd.f32 %v2540_v55, %v324_v29 }
 0x4c1   :  { %v2050_v38 = vpop.eup %2049 }
 0x4c2   :  { %v2052_v53 = vpop.eup %2051  ;;  %v1167_v40 = vmul.f32 %v2050_v38, %v2048_v32 }
 0x4c5   :  { %v2054_v14 = vpop.eup %2053 }
 0x4c6   :  { %v1168_v16 = vmul.f32 %v2054_v14, %v2052_v53  ;;  %v398_v53 = vadd.f32 %v2546_v46, %v321_v35  ;;  %v325_v14 = vadd.f32 %v3109_v33, %v239_v43 }
 0x4c8   :  { %v1169_v39 = vpack.c.bf16 %v1168_v16, %v1167_v40  ;;  %v236_v40 = vmul.f32 %v2469_v7, %v146_v57  ;;  %v402_v30 = vadd.f32 %v2546_v46, %v325_v14 }
 0x4ca   :  { %1203 = vmatmul.mubr.bf16.vlgmr.msra.gmra.mxu0 %v1169_v39  ;;  %1246 = vmatmul.mubr.bf16.vlgmr.msra.gmra.mxu1 %v1169_v39  ;;  %v322_v35 = vadd.f32 %v2479_v45, %v236_v40 }
 0x4cb   :  { %1306 = vmatpush1.bf16.msra.mxu0 %v2711_v1  ;;  %1349 = vmatpush1.bf16.msra.mxu1 %v2714_v62 }
 0x4cc   :  { %1307 = vmatprep.subr.bf16.mxu0 %v2717_v51  ;;  %1350 = vmatprep.subr.bf16.mxu1 %v2720_v54 }
 0x4cd   :  { %1337 = vmatprep.mubr.bf16.mxu0 %v3096_v60  ;;  %1380 = vmatprep.mubr.bf16.mxu1 %v3096_v60 }
 0x4cf   :  { %1308 = vmatpush1.bf16.msra.mxu0 %v2725_v50  ;;  %1351 = vmatpush1.bf16.msra.mxu1 %v2728_v61 }
 0x4d0   :  { %1309 = vmatprep.subr.bf16.mxu0 %v2731_v9  ;;  %1352 = vmatprep.subr.bf16.mxu1 %v2734_v59 }
 0x4d3   :  { %1310 = vmatpush1.bf16.msra.mxu0 %v2737_v2  ;;  %1353 = vmatpush1.bf16.msra.mxu1 %v2740_v47 }
 0x4d4   :  { %1311 = vmatprep.subr.bf16.mxu0 %v2743_v3  ;;  %1354 = vmatprep.subr.bf16.mxu1 %v2746_v6 }
 0x4d7   :  { %1312 = vmatpush1.bf16.msra.mxu0 %v2749_v5  ;;  %1355 = vmatpush1.bf16.msra.mxu1 %v2752_v58 }
 0x4d8   :  { %1313 = vmatprep.subr.bf16.mxu0 %v2755_v4  ;;  %1356 = vmatprep.subr.bf16.mxu1 %v2758_v56 }
 0x4db   :  { %1314 = vmatpush1.bf16.msra.mxu0 %v2761_v52  ;;  %1357 = vmatpush1.bf16.msra.mxu1 %v2764_v48 }
 0x4dc   :  { %1315 = vmatprep.subr.bf16.mxu0 %v2767_v11  ;;  %1358 = vmatprep.subr.bf16.mxu1 %v2770_v0 }
 0x4df   :  { %1316 = vmatpush1.bf16.msra.mxu0 %v2773_v12  ;;  %1359 = vmatpush1.bf16.msra.mxu1 %v2776_v13 }
 0x4e0   :  { %1317 = vmatprep.subr.bf16.mxu0 %v2779_v15  ;;  %1360 = vmatprep.subr.bf16.mxu1 %v2782_v17 }
 0x4e3   :  { %1318 = vmatpush1.bf16.msra.mxu0 %v2785_v18  ;;  %1361 = vmatpush1.bf16.msra.mxu1 %v2788_v19 }
 0x4e4   :  { %1319 = vmatprep.subr.bf16.mxu0 %v2791_v20  ;;  %1362 = vmatprep.subr.bf16.mxu1 %v2794_v21 }
 0x4e7   :  { %1320 = vmatpush1.bf16.msra.mxu0 %v2797_v23  ;;  %1363 = vmatpush1.bf16.msra.mxu1 %v2800_v24 }
 0x4e8   :  { %1440 = vmatprep.subr.bf16.mxu0 %v2803_v10  ;;  %1483 = vmatprep.subr.bf16.mxu1 %v3106_v37 }
 0x58a   :  { %v1204_v32 = vpop.f32.mrf.mxu0  ;;  %v1247_v31 = vpop.f32.mrf.mxu1 }
 0x58b   :  { %v1205_v38 = vadd.f32 %v1204_v32, %v397_v36  ;;  %v240_v36 = vmul.f32 %v2469_v7, %v151_v26 }
 0x58c   :  { %v1206_v16 = vpop.f32.mrf.mxu0 }
 0x58d   :  { %v1814_v39 = vmul.f32 -1.442695, %v1205_v38  ;;  %v1207_v41 = vadd.f32 %v1206_v16, %v398_v53  ;;  %v237_v38 = vmul.f32 %v2476_v44, %v146_v57  ;;  %v1249_v53 = vpop.f32.mrf.mxu1  ;;  %v399_v16 = vadd.f32 %v2558_v42, %v322_v35 }
 0x58e   :  { %v1208_v27 = vpop.f32.mrf.mxu0 }
 0x58f   :  { %2055 = vpow2.f32 %v1814_v39  ;;  %v1815_v37 = vmul.f32 -1.442695, %v1207_v41  ;;  %v1209_v22 = vadd.f32 %v1208_v27, %v401_v25  ;;  %v326_v41 = vadd.f32 %v2479_v45, %v240_v36  ;;  %v1251_v40 = vpop.f32.mrf.mxu1 }
 0x590   :  { %v1210_v32 = vpop.f32.mrf.mxu0  ;;  %v241_v27 = vmul.f32 %v2476_v44, %v151_v26  ;;  %v1248_v14 = vadd.f32 %v1247_v31, %v399_v16  ;;  %v323_v39 = vadd.f32 %v2483_v49, %v237_v38 }
 0x591   :  { %2057 = vpow2.f32 %v1815_v37  ;;  %v1817_v43 = vmul.f32 -1.442695, %v1209_v22  ;;  %v1211_v33 = vadd.f32 %v1210_v32, %v402_v30  ;;  %v403_v37 = vadd.f32 %v2558_v42, %v326_v41 }
 0x592   :  { %v1816_v25 = vmul.f32 -1.442695, %v1248_v14  ;;  %v400_v22 = vadd.f32 %v2565_v63, %v323_v39  ;;  %v327_v30 = vadd.f32 %v2483_v49, %v241_v27 }
 0x593   :  { %2059 = vpow2.f32 %v1817_v43  ;;  %v1818_v29 = vmul.f32 -1.442695, %v1211_v33  ;;  %v1252_v57 = vadd.f32 %v1251_v40, %v403_v37  ;;  %v1253_v43 = vpop.f32.mrf.mxu1 }
 0x594   :  { %v1250_v32 = vadd.f32 %v1249_v53, %v400_v22  ;;  %v404_v26 = vadd.f32 %v2565_v63, %v327_v30 }
 0x595   :  { %2061 = vpow2.f32 %v1818_v29  ;;  %v1819_v29 = vmul.f32 -1.442695, %v1252_v57 }
 0x596   :  { %2063 = vpow2.f32 %v1816_v25  ;;  %v1254_v16 = vadd.f32 %v1253_v43, %v404_v26 }
 0x59c   :  { %v2056_v33 = vpop.eup %2055 }
 0x59d   :  { %v1274_v35 = vadd.f32 1.0, %v2056_v33 }
 0x59e   :  { %v2058_v36 = vpop.eup %2057 }
 0x59f   :  { %2065 = vrcp.f32 %v1274_v35  ;;  %v1275_v31 = vadd.f32 1.0, %v2058_v36 }
 0x5a0   :  { %v2060_v38 = vpop.eup %2059  ;;  %2067 = vtanh.f32 %v1250_v32 }
 0x5a1   :  { %2069 = vrcp.f32 %v1275_v31  ;;  %v1277_v41 = vadd.f32 1.0, %v2060_v38 }
 0x5a2   :  { %v2062_v14 = vpop.eup %2061  ;;  %2071 = vpow2.f32 %v1819_v29 }
 0x5a3   :  { %2073 = vrcp.f32 %v1277_v41  ;;  %v1278_v27 = vadd.f32 1.0, %v2062_v14  ;;  %v2064_v53 = vpop.eup %2063 }
 0x5a4   :  { %2075 = vtanh.f32 %v1254_v16  ;;  %v1276_v33 = vadd.f32 1.0, %v2064_v53 }
 0x5a5   :  { %2077 = vrcp.f32 %v1278_v27 }
 0x5a6   :  { %2079 = vrcp.f32 %v1276_v33 }
 0x5ac   :  { %v2066_v39 = vpop.eup %2065 }
 0x5ad   :  { %v2068_v40 = vpop.eup %2067 }
 0x5ae   :  { %v2070_v37 = vpop.eup %2069  ;;  %v1296_v57 = vmul.f32 %v2068_v40, %v2066_v39  ;;  %v156_v39 = vpop.permute.xlu0 %155  ;;  %v3111_v40 = vld [vmem:[#allocation7_spill] sm:$0xff] }
 0x5af   :  { %v2072_v25 = vpop.eup %2071  ;;  %v1294_v22 = vmul.f32 %v2070_v37, %v2834_v34  ;;  %v242_v37 = vmul.f32 %v3111_v40, %v156_v39 }
 0x5b0   :  { %v2074_v30 = vpop.eup %2073  ;;  %v1279_v36 = vadd.f32 1.0, %v2072_v25  ;;  %v3112_v25 = vld [vmem:[#allocation8_spill] sm:$0xff] }
 0x5b1   :  { %v2076_v32 = vpop.eup %2075  ;;  %v2900_v35 = vadd.f32 %v1296_v57, %v1294_v22  ;;  %v243_v22 = vmul.f32 %v3112_v25, %v156_v39  ;;  %v161_v57 = vpop.permute.xlu1 %160  ;;  %v328_v33 = vadd.f32 %v3100_v8, %v242_v37 }
 0x5b2   :  { %v2078_v43 = vpop.eup %2077  ;;  %v1297_v26 = vmul.f32 %v2076_v32, %v2074_v30  ;;  %v246_v30 = vmul.f32 %v3111_v40, %v161_v57  ;;  %v247_v32 = vmul.f32 %v3112_v25, %v161_v57 }
 0x5b3   :  { %v1295_v29 = vmul.f32 %v2078_v43, %v2838_v28  ;;  %2081 = vtanh.f32 %v2900_v35  ;;  %v2080_v34 = vpop.eup %2079  ;;  %v3110_v28 = vld [vmem:[#allocation9_spill] sm:$0xff]  ;;  %v3113_v43 = vld [vmem:[#allocation10_spill] sm:$0xff] }
 0x5b4   :  { %2083 = vrcp.f32 %v1279_v36  ;;  %v329_v36 = vadd.f32 %v3113_v43, %v243_v22 }
 0x5b5   :  { %v2904_v31 = vadd.f32 %v1297_v26, %v1295_v29  ;;  %v405_v29 = vadd.f32 %v2540_v55, %v328_v33 }
 0x5b7   :  { %2085 = vtanh.f32 %v2904_v31 }
 0x5c0   :  { %v2082_v38 = vpop.eup %2081 }
 0x5c1   :  { %v2084_v16 = vpop.eup %2083  ;;  %v1302_v14 = vmul.f32 %v2082_v38, %v2080_v34  ;;  %v406_v38 = vadd.f32 %v2546_v46, %v329_v36 }
 0x5c4   :  { %v2086_v41 = vpop.eup %2085 }
 0x5c5   :  { %v1303_v27 = vmul.f32 %v2086_v41, %v2084_v16  ;;  %v333_v16 = vadd.f32 %v3113_v43, %v247_v32  ;;  %v244_v41 = vmul.f32 %v2469_v7, %v156_v39 }
 0x5c7   :  { %v1304_v53 = vpack.c.bf16 %v1303_v27, %v1302_v14  ;;  %v330_v36 = vadd.f32 %v2479_v45, %v244_v41 }
 0x5c9   :  { %1338 = vmatmul.mubr.bf16.vlgmr.msra.gmra.mxu0 %v1304_v53  ;;  %1381 = vmatmul.mubr.bf16.vlgmr.msra.gmra.mxu1 %v1304_v53 }
 0x5ca   :  { %1441 = vmatpush1.bf16.msra.mxu0 %v2711_v1  ;;  %1484 = vmatpush1.bf16.msra.mxu1 %v2714_v62 }
 0x5cb   :  { %1442 = vmatprep.subr.bf16.mxu0 %v2717_v51  ;;  %1485 = vmatprep.subr.bf16.mxu1 %v2720_v54 }
 0x5cc   :  { %1472 = vmatprep.mubr.bf16.mxu0 %v3096_v60  ;;  %1515 = vmatprep.mubr.bf16.mxu1 %v3096_v60 }
 0x5ce   :  { %1443 = vmatpush1.bf16.msra.mxu0 %v2725_v50  ;;  %1486 = vmatpush1.bf16.msra.mxu1 %v2728_v61 }
 0x5cf   :  { %1444 = vmatprep.subr.bf16.mxu0 %v2731_v9  ;;  %1487 = vmatprep.subr.bf16.mxu1 %v2734_v59 }
 0x5d2   :  { %1445 = vmatpush1.bf16.msra.mxu0 %v2737_v2  ;;  %1488 = vmatpush1.bf16.msra.mxu1 %v2740_v47 }
 0x5d3   :  { %1446 = vmatprep.subr.bf16.mxu0 %v2743_v3  ;;  %1489 = vmatprep.subr.bf16.mxu1 %v2746_v6 }
 0x5d6   :  { %1447 = vmatpush1.bf16.msra.mxu0 %v2749_v5  ;;  %1490 = vmatpush1.bf16.msra.mxu1 %v2752_v58 }
 0x5d7   :  { %1448 = vmatprep.subr.bf16.mxu0 %v2755_v4  ;;  %1491 = vmatprep.subr.bf16.mxu1 %v2758_v56 }
 0x5da   :  { %1449 = vmatpush1.bf16.msra.mxu0 %v2761_v52  ;;  %1492 = vmatpush1.bf16.msra.mxu1 %v2764_v48 }
 0x5db   :  { %1450 = vmatprep.subr.bf16.mxu0 %v2767_v11  ;;  %1493 = vmatprep.subr.bf16.mxu1 %v2770_v0 }
 0x5de   :  { %1451 = vmatpush1.bf16.msra.mxu0 %v2773_v12  ;;  %1494 = vmatpush1.bf16.msra.mxu1 %v2776_v13 }
 0x5df   :  { %1452 = vmatprep.subr.bf16.mxu0 %v2779_v15  ;;  %1495 = vmatprep.subr.bf16.mxu1 %v2782_v17 }
 0x5e2   :  { %1453 = vmatpush1.bf16.msra.mxu0 %v2785_v18  ;;  %1496 = vmatpush1.bf16.msra.mxu1 %v2788_v19 }
 0x5e3   :  { %1454 = vmatprep.subr.bf16.mxu0 %v2791_v20  ;;  %1497 = vmatprep.subr.bf16.mxu1 %v2794_v21 }
 0x5e6   :  { %1455 = vmatpush1.bf16.msra.mxu0 %v2797_v23  ;;  %1498 = vmatpush1.bf16.msra.mxu1 %v2800_v24 }
 0x5e7   :  { %1575 = vmatprep.subr.bf16.mxu0 %v2803_v10  ;;  %1618 = vmatprep.subr.bf16.mxu1 %v3110_v28  ;;  %v332_v10 = vadd.f32 %v3100_v8, %v246_v30  ;;  %v410_v30 = vadd.f32 %v2546_v46, %v333_v16  ;;  %v249_v16 = vmul.f32 %v2476_v44, %v161_v57 }
 0x5e9   :  { %v409_v28 = vadd.f32 %v2540_v55, %v332_v10 }
 0x689   :  { %v1339_v26 = vpop.f32.mrf.mxu0  ;;  %v1382_v22 = vpop.f32.mrf.mxu1 }
 0x68a   :  { %v1340_v34 = vadd.f32 %v1339_v26, %v405_v29  ;;  %v248_v29 = vmul.f32 %v2469_v7, %v161_v57 }
 0x68b   :  { %v1341_v14 = vpop.f32.mrf.mxu0 }
 0x68c   :  { %v1820_v27 = vmul.f32 -1.442695, %v1340_v34  ;;  %v1342_v53 = vadd.f32 %v1341_v14, %v406_v38  ;;  %v245_v34 = vmul.f32 %v2476_v44, %v156_v39  ;;  %v1384_v38 = vpop.f32.mrf.mxu1  ;;  %v407_v14 = vadd.f32 %v2558_v42, %v330_v36 }
 0x68d   :  { %v1343_v37 = vpop.f32.mrf.mxu0 }
 0x68e   :  { %2087 = vpow2.f32 %v1820_v27  ;;  %v1821_v25 = vmul.f32 -1.442695, %v1342_v53  ;;  %v1344_v33 = vadd.f32 %v1343_v37, %v409_v28  ;;  %v334_v27 = vadd.f32 %v2479_v45, %v248_v29  ;;  %v1386_v41 = vpop.f32.mrf.mxu1 }
 0x68f   :  { %v1345_v26 = vpop.f32.mrf.mxu0  ;;  %v1383_v53 = vadd.f32 %v1382_v22, %v407_v14  ;;  %v331_v28 = vadd.f32 %v2483_v49, %v245_v34 }
 0x690   :  { %2089 = vpow2.f32 %v1821_v25  ;;  %v1823_v32 = vmul.f32 -1.442695, %v1344_v33  ;;  %v1346_v43 = vadd.f32 %v1345_v26, %v410_v30  ;;  %v411_v25 = vadd.f32 %v2558_v42, %v334_v27 }
 0x691   :  { %v1822_v37 = vmul.f32 -1.442695, %v1383_v53  ;;  %v408_v33 = vadd.f32 %v2565_v63, %v331_v28  ;;  %v335_v30 = vadd.f32 %v2483_v49, %v249_v16 }
 0x692   :  { %2091 = vpow2.f32 %v1823_v32  ;;  %v1824_v10 = vmul.f32 -1.442695, %v1346_v43  ;;  %v1387_v39 = vadd.f32 %v1386_v41, %v411_v25  ;;  %v1388_v32 = vpop.f32.mrf.mxu1 }
 0x693   :  { %v1385_v26 = vadd.f32 %v1384_v38, %v408_v33  ;;  %v412_v57 = vadd.f32 %v2565_v63, %v335_v30 }
 0x694   :  { %2093 = vpow2.f32 %v1824_v10  ;;  %v1825_v10 = vmul.f32 -1.442695, %v1387_v39 }
 0x695   :  { %2095 = vpow2.f32 %v1822_v37  ;;  %v1389_v14 = vadd.f32 %v1388_v32, %v412_v57 }
 0x69b   :  { %v2088_v43 = vpop.eup %2087 }
 0x69c   :  { %v1409_v36 = vadd.f32 1.0, %v2088_v43 }
 0x69d   :  { %v2090_v29 = vpop.eup %2089 }
 0x69e   :  { %2097 = vrcp.f32 %v1409_v36  ;;  %v1410_v22 = vadd.f32 1.0, %v2090_v29 }
 0x69f   :  { %v2092_v34 = vpop.eup %2091  ;;  %2099 = vtanh.f32 %v1385_v26 }
 0x6a0   :  { %2101 = vrcp.f32 %v1410_v22  ;;  %v1412_v27 = vadd.f32 1.0, %v2092_v34 }
 0x6a1   :  { %v2094_v53 = vpop.eup %2093  ;;  %2103 = vpow2.f32 %v1825_v10 }
 0x6a2   :  { %2105 = vrcp.f32 %v1412_v27  ;;  %v1413_v16 = vadd.f32 1.0, %v2094_v53  ;;  %v2096_v38 = vpop.eup %2095 }
 0x6a3   :  { %2107 = vtanh.f32 %v1389_v14  ;;  %v1411_v43 = vadd.f32 1.0, %v2096_v38 }
 0x6a4   :  { %2109 = vrcp.f32 %v1413_v16 }
 0x6a5   :  { %2111 = vrcp.f32 %v1411_v43 }
 0x6ab   :  { %v2098_v28 = vpop.eup %2097 }
 0x6ac   :  { %v2100_v41 = vpop.eup %2099 }
 0x6ad   :  { %v2102_v25 = vpop.eup %2101  ;;  %v1431_v39 = vmul.f32 %v2100_v41, %v2098_v28 }
 0x6ae   :  { %v2104_v37 = vpop.eup %2103  ;;  %v1429_v33 = vmul.f32 %v2102_v25, %v2900_v35 }
 0x6af   :  { %v2106_v30 = vpop.eup %2105  ;;  %v1414_v29 = vadd.f32 1.0, %v2104_v37 }
 0x6b0   :  { %v2108_v26 = vpop.eup %2107  ;;  %v2966_v36 = vadd.f32 %v1431_v39, %v1429_v33 }
 0x6b1   :  { %v2110_v32 = vpop.eup %2109  ;;  %v1432_v57 = vmul.f32 %v2108_v26, %v2106_v30 }
 0x6b2   :  { %v1430_v10 = vmul.f32 %v2110_v32, %v2904_v31  ;;  %2113 = vtanh.f32 %v2966_v36  ;;  %v2112_v35 = vpop.eup %2111 }
 0x6b3   :  { %2115 = vrcp.f32 %v1414_v29 }
 0x6b4   :  { %v2970_v22 = vadd.f32 %v1432_v57, %v1430_v10 }
 0x6b6   :  { %2117 = vtanh.f32 %v2970_v22 }
 0x6bf   :  { %v2114_v34 = vpop.eup %2113 }
 0x6c0   :  { %v2116_v14 = vpop.eup %2115  ;;  %v1437_v53 = vmul.f32 %v2114_v34, %v2112_v35 }
 0x6c3   :  { %v2118_v27 = vpop.eup %2117 }
 0x6c4   :  { %v1438_v16 = vmul.f32 %v2118_v27, %v2116_v14 }
 0x6c6   :  { %v1439_v38 = vpack.c.bf16 %v1438_v16, %v1437_v53 }
 0x6c8   :  { %1473 = vmatmul.mubr.bf16.vlgmr.msra.gmra.mxu0 %v1439_v38  ;;  %1516 = vmatmul.mubr.bf16.vlgmr.msra.gmra.mxu1 %v1439_v38 }
 0x6c9   :  { %1576 = vmatpush1.bf16.msra.mxu0 %v2711_v1  ;;  %1619 = vmatpush1.bf16.msra.mxu1 %v2714_v62  ;;  %v166_v1 = vpop.permute.xlu0 %165 }
 0x6ca   :  { %1577 = vmatprep.subr.bf16.mxu0 %v2717_v51  ;;  %1620 = vmatprep.subr.bf16.mxu1 %v2720_v54  ;;  %v250_v62 = vmul.f32 %v3111_v40, %v166_v1  ;;  %v171_v51 = vpop.permute.xlu1 %170  ;;  %v3114_v54 = vld [vmem:[#allocation8_spill] sm:$0xff]  ;;  %v253_v31 = vmul.f32 %v2476_v44, %v166_v1 }
 0x6cb   :  { %1607 = vmatprep.mubr.bf16.mxu0 %v3096_v60  ;;  %1650 = vmatprep.mubr.bf16.mxu1 %v3096_v60  ;;  %v1838_v60 = vld [vmem:[%s3064_s5] ss:$0 sm:$0xff]  ;;  %v257_v37 = vmul.f32 %v2476_v44, %v171_v51 }
 0x6cc   :  { %1715 = vrot.lane.b32.xlu0 %v1838_v60, %s2241_s19 }
 0x6cd   :  { %1578 = vmatpush1.bf16.msra.mxu0 %v2725_v50  ;;  %1621 = vmatpush1.bf16.msra.mxu1 %v2728_v61  ;;  %v251_v50 = vmul.f32 %v3114_v54, %v166_v1  ;;  %v254_v61 = vmul.f32 %v3111_v40, %v171_v51  ;;  %v343_v29 = vadd.f32 %v2483_v49, %v257_v37 }
 0x6ce   :  { %1579 = vmatprep.subr.bf16.mxu0 %v2731_v9  ;;  %1622 = vmatprep.subr.bf16.mxu1 %v2734_v59  ;;  %v336_v9 = vadd.f32 %v3100_v8, %v250_v62  ;;  %v255_v59 = vmul.f32 %v3114_v54, %v171_v51 }
 0x6cf   :  { %v420_v44 = vadd.f32 %v2565_v63, %v343_v29 }
 0x6d1   :  { %1580 = vmatpush1.bf16.msra.mxu0 %v2737_v2  ;;  %1623 = vmatpush1.bf16.msra.mxu1 %v2740_v47  ;;  %v3115_v2 = vld [vmem:[#allocation10_spill] sm:$0xff] }
 0x6d2   :  { %1581 = vmatprep.subr.bf16.mxu0 %v2743_v3  ;;  %1624 = vmatprep.subr.bf16.mxu1 %v2746_v6  ;;  %v337_v47 = vadd.f32 %v3115_v2, %v251_v50  ;;  %v413_v3 = vadd.f32 %v2540_v55, %v336_v9  ;;  %v340_v6 = vadd.f32 %v3100_v8, %v254_v61 }
 0x6d5   :  { %1582 = vmatpush1.bf16.msra.mxu0 %v2749_v5  ;;  %1625 = vmatpush1.bf16.msra.mxu1 %v2752_v58 }
 0x6d6   :  { %1583 = vmatprep.subr.bf16.mxu0 %v2755_v4  ;;  %1626 = vmatprep.subr.bf16.mxu1 %v2758_v56  ;;  %v414_v4 = vadd.f32 %v2546_v46, %v337_v47  ;;  %v341_v56 = vadd.f32 %v3115_v2, %v255_v59 }
 0x6d8   :  { %v418_v8 = vadd.f32 %v2546_v46, %v341_v56 }
 0x6d9   :  { %1584 = vmatpush1.bf16.msra.mxu0 %v2761_v52  ;;  %1627 = vmatpush1.bf16.msra.mxu1 %v2764_v48  ;;  %v252_v52 = vmul.f32 %v2469_v7, %v166_v1 }
 0x6da   :  { %1585 = vmatprep.subr.bf16.mxu0 %v2767_v11  ;;  %1628 = vmatprep.subr.bf16.mxu1 %v2770_v0 }
 0x6dd   :  { %1586 = vmatpush1.bf16.msra.mxu0 %v2773_v12  ;;  %1629 = vmatpush1.bf16.msra.mxu1 %v2776_v13  ;;  %v417_v12 = vadd.f32 %v2540_v55, %v340_v6 }
 0x6de   :  { %1587 = vmatprep.subr.bf16.mxu0 %v2779_v15  ;;  %1630 = vmatprep.subr.bf16.mxu1 %v2782_v17 }
 0x6e1   :  { %1588 = vmatpush1.bf16.msra.mxu0 %v2785_v18  ;;  %1631 = vmatpush1.bf16.msra.mxu1 %v2788_v19  ;;  %v256_v19 = vmul.f32 %v2469_v7, %v171_v51  ;;  %v339_v7 = vadd.f32 %v2483_v49, %v253_v31 }
 0x6e2   :  { %1589 = vmatprep.subr.bf16.mxu0 %v2791_v20  ;;  %1632 = vmatprep.subr.bf16.mxu1 %v2794_v21  ;;  %v338_v20 = vadd.f32 %v2479_v45, %v252_v52 }
 0x6e3   :  { %v342_v25 = vadd.f32 %v2479_v45, %v256_v19  ;;  %v416_v26 = vadd.f32 %v2565_v63, %v339_v7 }
 0x6e4   :  { %v415_v41 = vadd.f32 %v2558_v42, %v338_v20 }
 0x6e5   :  { %1590 = vmatpush1.bf16.msra.mxu0 %v2797_v23  ;;  %1633 = vmatpush1.bf16.msra.mxu1 %v2800_v24  ;;  %v419_v30 = vadd.f32 %v2558_v42, %v342_v25 }
 0x788   :  { %v1474_v5 = vpop.f32.mrf.mxu0  ;;  %v1517_v15 = vpop.f32.mrf.mxu1 }
 0x789   :  { %v1475_v58 = vadd.f32 %v1474_v5, %v413_v3  ;;  %v1518_v33 = vadd.f32 %v1517_v15, %v415_v41 }
 0x78a   :  { %v1476_v48 = vpop.f32.mrf.mxu0  ;;  %v1519_v40 = vpop.f32.mrf.mxu1 }
 0x78b   :  { %v1826_v11 = vmul.f32 -1.442695, %v1475_v58  ;;  %v1477_v0 = vadd.f32 %v1476_v48, %v414_v4  ;;  %v1828_v43 = vmul.f32 -1.442695, %v1518_v33  ;;  %v1520_v57 = vadd.f32 %v1519_v40, %v416_v26 }
 0x78c   :  { %v1478_v13 = vpop.f32.mrf.mxu0  ;;  %v1521_v39 = vpop.f32.mrf.mxu1 }
 0x78d   :  { %2119 = vpow2.f32 %v1826_v11  ;;  %v1827_v17 = vmul.f32 -1.442695, %v1477_v0  ;;  %v1479_v18 = vadd.f32 %v1478_v13, %v417_v12  ;;  %v1522_v32 = vadd.f32 %v1521_v39, %v419_v30 }
 0x78e   :  { %v1480_v21 = vpop.f32.mrf.mxu0  ;;  %v1523_v34 = vpop.f32.mrf.mxu1 }
 0x78f   :  { %2121 = vpow2.f32 %v1827_v17  ;;  %v1829_v23 = vmul.f32 -1.442695, %v1479_v18  ;;  %v1481_v24 = vadd.f32 %v1480_v21, %v418_v8  ;;  %v1831_v14 = vmul.f32 -1.442695, %v1522_v32 }
 0x790   :  { %v1524_v16 = vadd.f32 %v1523_v34, %v420_v44 }
 0x791   :  { %2123 = vpow2.f32 %v1829_v23  ;;  %v1830_v28 = vmul.f32 -1.442695, %v1481_v24 }
 0x793   :  { %2125 = vpow2.f32 %v1830_v28 }
 0x794   :  { %2127 = vpow2.f32 %v1828_v43 }
 0x79a   :  { %v2120_v10 = vpop.eup %2119 }
 0x79b   :  { %v1544_v35 = vadd.f32 1.0, %v2120_v10 }
 0x79c   :  { %v2122_v45 = vpop.eup %2121 }
 0x79d   :  { %2129 = vrcp.f32 %v1544_v35  ;;  %v1545_v27 = vadd.f32 1.0, %v2122_v45 }
 0x79e   :  { %v2124_v53 = vpop.eup %2123  ;;  %2131 = vtanh.f32 %v1520_v57 }
 0x79f   :  { %2133 = vrcp.f32 %v1545_v27  ;;  %v1547_v38 = vadd.f32 1.0, %v2124_v53 }
 0x7a0   :  { %v2126_v60 = vpop.eup %2125  ;;  %2135 = vpow2.f32 %v1831_v14 }
 0x7a1   :  { %2137 = vrcp.f32 %v1547_v38  ;;  %v1548_v49 = vadd.f32 1.0, %v2126_v60  ;;  %v2128_v1 = vpop.eup %2127 }
 0x7a2   :  { %2139 = vtanh.f32 %v1524_v16  ;;  %v1546_v2 = vadd.f32 1.0, %v2128_v1 }
 0x7a3   :  { %2141 = vrcp.f32 %v1548_v49 }
 0x7a4   :  { %2143 = vrcp.f32 %v1546_v2 }
 0x7aa   :  { %v2130_v62 = vpop.eup %2129 }
 0x7ab   :  { %v2132_v51 = vpop.eup %2131 }
 0x7ac   :  { %v2134_v54 = vpop.eup %2133  ;;  %v1566_v9 = vmul.f32 %v2132_v51, %v2130_v62 }
 0x7ad   :  { %v2136_v50 = vpop.eup %2135  ;;  %v1564_v61 = vmul.f32 %v2134_v54, %v2966_v36 }
 0x7ae   :  { %v2138_v59 = vpop.eup %2137  ;;  %v1549_v5 = vadd.f32 1.0, %v2136_v50 }
 0x7af   :  { %v2140_v47 = vpop.eup %2139  ;;  %v3034_v3 = vadd.f32 %v1566_v9, %v1564_v61 }
 0x7b0   :  { %v2142_v6 = vpop.eup %2141  ;;  %v1567_v4 = vmul.f32 %v2140_v47, %v2138_v59  ;;  %v1716_v59 = vpop.permute.xlu0 %1715 }
 0x7b1   :  { %v1565_v58 = vmul.f32 %v2142_v6, %v2970_v22  ;;  %2145 = vtanh.f32 %v3034_v3  ;;  %v2144_v36 = vpop.eup %2143 }
 0x7b2   :  { %2147 = vrcp.f32 %v1549_v5 }
 0x7b3   :  { %v3038_v56 = vadd.f32 %v1567_v4, %v1565_v58 }
 0x7b5   :  { %2149 = vtanh.f32 %v3038_v56 }
 0x7be   :  { %v2146_v52 = vpop.eup %2145 }
 0x7bf   :  { %v2148_v48 = vpop.eup %2147  ;;  %v1572_v0 = vmul.f32 %v2146_v52, %v2144_v36 }
 0x7c2   :  { %v2150_v11 = vpop.eup %2149 }
 0x7c3   :  { %v1573_v12 = vmul.f32 %v2150_v11, %v2148_v48  ;;  %v1839_v48 = vld [vmem:[#allocation2] ss:$0 sm:$0xff] }
 0x7c5   :  { %v1574_v13 = vpack.c.bf16 %v1573_v12, %v1572_v0 }
 0x7c7   :  { %1608 = vmatmul.mubr.bf16.vlgmr.msra.gmra.mxu0 %v1574_v13  ;;  %1651 = vmatmul.mubr.bf16.vlgmr.msra.gmra.mxu1 %v1574_v13 }
 0x887   :  { %v1609_v15 = vpop.f32.mrf.mxu0  ;;  %v1652_v20 = vpop.f32.mrf.mxu1 }
 0x888   :  { %v1610_v22 = vadd.f32 %v1609_v15, %v2540_v55  ;;  %v1653_v25 = vadd.f32 %v1652_v20, %v2558_v42 }
 0x889   :  { %v1611_v17 = vpop.f32.mrf.mxu0  ;;  %v1654_v28 = vpop.f32.mrf.mxu1 }
 0x88a   :  { %v1832_v18 = vmul.f32 -1.442695, %v1610_v22  ;;  %v1612_v8 = vadd.f32 %v1611_v17, %v2546_v46  ;;  %v1834_v33 = vmul.f32 -1.442695, %v1653_v25  ;;  %v1655_v30 = vadd.f32 %v1654_v28, %v2565_v63 }
 0x88b   :  { %v1613_v19 = vpop.f32.mrf.mxu0  ;;  %v1656_v37 = vpop.f32.mrf.mxu1 }
 0x88c   :  { %2151 = vpow2.f32 %v1832_v18  ;;  %v1833_v21 = vmul.f32 -1.442695, %v1612_v8  ;;  %v1614_v23 = vadd.f32 %v1613_v19, %v2540_v55  ;;  %v1657_v7 = vadd.f32 %v1656_v37, %v2558_v42 }
 0x88d   :  { %v1615_v24 = vpop.f32.mrf.mxu0  ;;  %v1658_v55 = vpop.f32.mrf.mxu1 }
 0x88e   :  { %2153 = vpow2.f32 %v1833_v21  ;;  %v1835_v31 = vmul.f32 -1.442695, %v1614_v23  ;;  %v1616_v40 = vadd.f32 %v1615_v24, %v2546_v46  ;;  %v1837_v32 = vmul.f32 -1.442695, %v1657_v7 }
 0x88f   :  { %v1659_v10 = vadd.f32 %v1658_v55, %v2565_v63 }
 0x890   :  { %2155 = vpow2.f32 %v1835_v31  ;;  %v1836_v41 = vmul.f32 -1.442695, %v1616_v40 }
 0x892   :  { %2157 = vpow2.f32 %v1836_v41 }
 0x893   :  { %2159 = vpow2.f32 %v1834_v33 }
 0x899   :  { %v2152_v39 = vpop.eup %2151 }
 0x89a   :  { %v1679_v43 = vadd.f32 1.0, %v2152_v39 }
 0x89b   :  { %v2154_v26 = vpop.eup %2153 }
 0x89c   :  { %2161 = vrcp.f32 %v1679_v43  ;;  %v1680_v46 = vadd.f32 1.0, %v2154_v26 }
 0x89d   :  { %v2156_v29 = vpop.eup %2155  ;;  %2163 = vtanh.f32 %v1655_v30 }
 0x89e   :  { %2165 = vrcp.f32 %v1680_v46  ;;  %v1682_v57 = vadd.f32 1.0, %v2156_v29 }
 0x89f   :  { %v2158_v35 = vpop.eup %2157  ;;  %2167 = vpow2.f32 %v1837_v32 }
 0x8a0   :  { %2169 = vrcp.f32 %v1682_v57  ;;  %v1683_v42 = vadd.f32 1.0, %v2158_v35  ;;  %v2160_v34 = vpop.eup %2159 }
 0x8a1   :  { %2171 = vtanh.f32 %v1659_v10  ;;  %v1681_v27 = vadd.f32 1.0, %v2160_v34 }
 0x8a2   :  { %2173 = vrcp.f32 %v1683_v42 }
 0x8a3   :  { %2175 = vrcp.f32 %v1681_v27 }
 0x8a9   :  { %v2162_v45 = vpop.eup %2161 }
 0x8aa   :  { %v2164_v14 = vpop.eup %2163 }
 0x8ab   :  { %v2166_v44 = vpop.eup %2165  ;;  %v1701_v38 = vmul.f32 %v2164_v14, %v2162_v45 }
 0x8ac   :  { %v2168_v53 = vpop.eup %2167  ;;  %v1699_v16 = vmul.f32 %v2166_v44, %v3034_v3 }
 0x8ad   :  { %v2170_v60 = vpop.eup %2169  ;;  %v1684_v62 = vadd.f32 1.0, %v2168_v53 }
 0x8ae   :  { %v2172_v49 = vpop.eup %2171  ;;  %v1703_v63 = vadd.f32 %v1701_v38, %v1699_v16 }
 0x8af   :  { %v2174_v1 = vpop.eup %2173  ;;  %v1702_v54 = vmul.f32 %v2172_v49, %v2170_v60 }
 0x8b0   :  { %2177 = vtanh.f32 %v1703_v63  ;;  %v1700_v51 = vmul.f32 %v2174_v1, %v3038_v56  ;;  %v2176_v61 = vpop.eup %2175 }
 0x8b1   :  { %2179 = vrcp.f32 %v1684_v62 }
 0x8b2   :  { %v1704_v50 = vadd.f32 %v1702_v54, %v1700_v51 }
 0x8b4   :  { %2181 = vtanh.f32 %v1704_v50 }
 0x8bd   :  { %v2178_v9 = vpop.eup %2177 }
 0x8be   :  { %v1707_v2 = vmul.f32 %v2178_v9, %v2176_v61  ;;  %v2180_v47 = vpop.eup %2179 }
 0x8c0   :  { %v1718_v3 = vmul.f32 %v1716_v59, %v1707_v2 }
 0x8c1   :  { %v2182_v6 = vpop.eup %2181 }
 0x8c2   :  { %v1708_v5 = vmul.f32 %v2182_v6, %v2180_v47  ;;  %1722 = vrot.lane.b32.xlu1 %v1718_v3, %s2241_s19 }
 0x8c4   :  { %v1719_v58 = vmul.f32 %v1716_v59, %v1708_v5 }
 0x8c6   :  { %1724 = vrot.lane.b32.xlu0 %v1719_v58, %s2241_s19 }
 0x934   :  { %v1723_v4 = vpop.permute.xlu1 %1722 }
 0x935   :  { %v1729_v56 = vsel %vm1728_vm0, %v1723_v4, 0.0 }
 0x936   :  { %1730 = vadd.xlane.f32.xlu1 %v1729_v56 }
 0x938   :  { %v1725_v36 = vpop.permute.xlu0 %1724 }
 0x939   :  { %v1732_v52 = vsel %vm1728_vm0, %v1725_v36, 0.0 }
 0x93a   :  { %1733 = vadd.xlane.f32.xlu0 %v1732_v52 }
 0x9bf   :  { %v1731_v11 = vpop.xlane.xlu1 %1730 }
 0x9c0   :  { %v1742_v0 = vadd.f32 %v1839_v48, %v1731_v11 }
 0x9c2   :  { %1745 = vst.msk [vmem:[%s3066_s7] sm:$0xff] %vm1744_vm1, %v1742_v0 }
 0x9c3   :  { %v1734_v12 = vpop.xlane.xlu0 %1733 }
 0x9c4   :  { %v1743_v13 = vadd.f32 %v1839_v48, %v1734_v12 }
 0x9c6   :  { %1746 = vst.msk [vmem:[%s3066_s7 + $0x8] sm:$0xff] %vm1744_vm1, %v1743_v13 }
 0x9c7   :  { %1751 = vsyncpa [#allocation4], 1 }

</bundles_post_ra>
